<compile_context>
chip_gen: v7x
topology: tpu7x:2x2x1
jax: 0.10.0
libtpu: 0.0.40
codegen_flags: <defaults>
</compile_context>

<pallas_src>
import functools

import jax
import jax.numpy as jnp
import numpy as np
from jax.experimental import pallas as pl
from jax.experimental.pallas import tpu as pltpu


def rnn_encoder_kernel(lens_ref, xf_ref, xb_ref, w_ih_ref, w_hh_ref, b_ref,
                       out_f_ref, out_b_ref, hn_ref, cn_ref,
                       h_st, c_st, xgf_st, xgb_st, accf_st, accb_st,
                       *, hidden_size, time_block, batch):
    H, TB, B = hidden_size, time_block, batch
    g = pl.program_id(0)
    G = pl.num_programs(0)

    # Reset the recurrent state at the start of the sweep (both directions).
    @pl.when(g == 0)
    def _():
        h_st[...] = jnp.zeros_like(h_st)
        c_st[...] = jnp.zeros_like(c_st)

    # ---- per-chunk hoisted input projection (MXU, off the serial chain) ------
    w_ih_f, w_ih_b = w_ih_ref[0], w_ih_ref[1]            # (I, 4H) bf16
    bias_f, bias_b = b_ref[0], b_ref[1]                  # (1, 4H) f32
    for b in range(B):                                   # per-row 2-D dots (B small)
        xgf_st[b] = jnp.dot(xf_ref[b].astype(jnp.bfloat16), w_ih_f,
                            preferred_element_type=jnp.float32) + bias_f
        xgb_st[b] = jnp.dot(xb_ref[b].astype(jnp.bfloat16), w_ih_b,
                            preferred_element_type=jnp.float32) + bias_b

    w_hh_f, w_hh_b = w_hh_ref[0], w_hh_ref[1]            # (H, 4H) bf16

    # ---- constants hoisted off the recurrence --------------------------------
    lens = lens_ref[...]                                 # (B, 1) int32
    lens2 = jnp.concatenate([lens, lens], axis=0)        # (2B, 1)
    row = jax.lax.broadcasted_iota(jnp.int32, (2 * B, 1), 0)
    row_is_fwd = row < B
    col = jax.lax.broadcasted_iota(jnp.int32, (2 * B, 4 * H), 1)
    is_g_gate = (col >= 2 * H) & (col < 3 * H)
    # tanh(x) = 2*sigmoid(2x) - 1 on the g-gate lanes (the 2x is folded into the
    # g-gate weight/bias columns by the wrapper).
    act_mul = jnp.where(is_g_gate, 2.0, 1.0)
    act_off = jnp.where(is_g_gate, -1.0, 0.0)

    t_fwd_base = g * TB                                  # fwd walks chunks 0..G-1
    t_bwd_base = (G - 1 - g) * TB                        # bwd walks chunks G-1..0

    h = h_st[...]                                        # (2B, H): [fwd | bwd]
    c = c_st[...]

    # ---- interleaved fwd+bwd recurrence over the chunk (static unroll) -------
    for s in range(TB):
        sb = TB - 1 - s                                  # bwd walks the chunk reversed
        h16 = h.astype(jnp.bfloat16)
        gate_f = xgf_st[:, s, :] + jnp.dot(h16[:B], w_hh_f,
                                           preferred_element_type=jnp.float32)
        gate_b = xgb_st[:, sb, :] + jnp.dot(h16[B:], w_hh_b,
                                            preferred_element_type=jnp.float32)
        z = jnp.concatenate([gate_f, gate_b], axis=0)    # (2B, 4H) = one vreg
        a = jax.nn.sigmoid(z) * act_mul + act_off        # i,f,o: sigmoid; g: tanh
        # PyTorch LSTM gate order along 4H: i, f, g, o
        i_g = a[:, 0 * H:1 * H]
        f_g = a[:, 1 * H:2 * H]
        g_g = a[:, 2 * H:3 * H]
        o_g = a[:, 3 * H:4 * H]
        c_new = f_g * c + i_g * g_g
        h_new = o_g * jnp.tanh(c_new)
        # packed-sequence masking: padded steps update nothing and output 0.
        t_vec = jnp.where(row_is_fwd, t_fwd_base + s, t_bwd_base + sb)
        valid = t_vec < lens2                            # (2B, 1)
        h = jnp.where(valid, h_new, h)
        c = jnp.where(valid, c_new, c)
        h_out = jnp.where(valid, h_new, 0.0)
        accf_st[:, s * H:(s + 1) * H] = h_out[:B]        # static lane offsets
        accb_st[:, sb * H:(sb + 1) * H] = h_out[B:]

    h_st[...] = h
    c_st[...] = c

    # One lane-dense (B, TB*H) store per chunk per direction.
    out_f_ref[0] = accf_st[...]
    out_b_ref[0] = accb_st[...]

    # Final (masked) hidden / cell state of both directions.
    @pl.when(g == G - 1)
    def _():
        hn_ref[...] = h
        cn_ref[...] = c


def _vmem_budget_bytes(B, TB, I, H, x_itemsize):
    """Padded VMEM footprint of the pipeline blocks + scratch, with headroom."""
    def tile(shape, itemsize):
        lead = 1
        for d in shape[:-2]:
            lead *= d
        sub = -(-shape[-2] // 8) * 8
        lane = -(-shape[-1] // 128) * 128
        return lead * sub * lane * itemsize

    blocks = (tile((B, 1), 4)
              + 2 * tile((B, TB, I), x_itemsize)          # fwd + bwd x chunks
              + tile((2, I, 4 * H), 2) + tile((2, H, 4 * H), 2)
              + tile((2, 1, 4 * H), 4)
              + 2 * tile((1, B, TB * H), 4)               # fwd + bwd out blocks
              + 2 * tile((2 * B, H), 4))                  # h_n / c_n
    scratch = (2 * tile((2 * B, H), 4)
               + 2 * tile((B, TB, 4 * H), 4)
               + 2 * tile((B, TB * H), 4))
    est = 2 * blocks + scratch                            # double-buffered blocks
    return int(min(max(2 * est, 4 << 20), 32 << 20))      # headroom, v7x-safe cap


def init_params(key, input_size, hidden_size):
    I, H = input_size, hidden_size
    ks = jax.random.split(key, 8)

    def xavier(k, shape):                      # torch weight shape [out, in]
        fan_out, fan_in = shape
        bound = (6.0 / (fan_in + fan_out)) ** 0.5
        return jax.random.uniform(k, shape, jnp.float32, -bound, bound)

    params = dict(
        # LSTM weights pre-transposed to x @ W layout, stacked [fwd, bwd], bf16.
        w_ih=jnp.stack([xavier(ks[0], (4 * H, I)).T,
                        xavier(ks[2], (4 * H, I)).T]).astype(jnp.bfloat16),   # (2, I, 4H)
        w_hh=jnp.stack([xavier(ks[1], (4 * H, H)).T,
                        xavier(ks[3], (4 * H, H)).T]).astype(jnp.bfloat16),   # (2, H, 4H)
        # init_weight(): all LSTM biases are zero (b = bias_ih + bias_hh).
        b=jnp.zeros((2, 1, 4 * H), jnp.float32),
    )
    # reduce_h_W / reduce_c_W : Linear(2H -> H), default torch-like uniform init
    bound = 1.0 / (2 * H) ** 0.5
    params.update(
        w_rh=jax.random.uniform(ks[4], (2 * H, H), jnp.float32, -bound, bound),
        b_rh=jax.random.uniform(ks[5], (1, H), jnp.float32, -bound, bound),
        w_rc=jax.random.uniform(ks[6], (2 * H, H), jnp.float32, -bound, bound),
        b_rc=jax.random.uniform(ks[7], (1, H), jnp.float32, -bound, bound),
    )
    return params


def rnn_encoder_forward(embedded_words, input_lens, params, hidden_size,
                        time_block=8):
    """Mirrors RNNEncoder.forward (bidirect=True).

    embedded_words: [B, T, I] (batch_first, as in torch), any float dtype.
    input_lens:     host numpy int array, sorted descending (the
                    pack_padded_sequence contract); input_lens[0] is the static
                    max length (no device->host sync needed).
    Returns (output [max_len, B, 2H] time-major, context_mask [B, max_len],
             (new_h, new_c)), matching the PyTorch module.
    """
    B, T, I = embedded_words.shape
    H = hidden_size

    input_lens = np.asarray(input_lens, dtype=np.int32)
    max_length = int(input_lens[0])            # host value, no device sync

    # --- time-chunking: TB = multiple of 8 (x block 2nd-to-last dim), capped ---
    TB = max(1, int(time_block))
    TB = -(-TB // 8) * 8                       # round UP to a multiple of 8
    TB = min(TB, -(-T // 8) * 8)               # don't exceed padded seq length
    TB = min(TB, 32)                           # static-unroll cap (see kernel TODO)
    G = -(-T // TB)                            # cdiv
    T_pad = G * TB

    x = embedded_words                         # batch-first, original dtype (no transpose/cast)
    if T_pad != T:                             # tail pad only when needed (masked in-kernel)
        x = jnp.pad(x, ((0, 0), (0, T_pad - T), (0, 0)))

    # Fold the 2x of tanh(x) = 2*sigmoid(2x) - 1 into the g-gate columns
    # (exact: power-of-two scaling of bf16 weights / f32 bias).
    sl = slice(2 * H, 3 * H)
    w_ih = params["w_ih"].at[:, :, sl].multiply(2.0)
    w_hh = params["w_hh"].at[:, :, sl].multiply(2.0)
    bias = params["b"].at[:, :, sl].multiply(2.0)

    lens2d = jnp.asarray(input_lens).reshape(B, 1)

    kernel = functools.partial(rnn_encoder_kernel, hidden_size=H,
                               time_block=TB, batch=B)

    grid_spec = pltpu.PrefetchScalarGridSpec(
        num_scalar_prefetch=0,
        grid=(G,),                                                     # time-chunk axis
        in_specs=[
            pl.BlockSpec((B, 1), lambda g: (0, 0)),                    # lens
            pl.BlockSpec((B, TB, I), lambda g: (0, g, 0)),             # x, fwd chunk
            pl.BlockSpec((B, TB, I), lambda g: (0, G - 1 - g, 0)),     # x, bwd chunk
            pl.BlockSpec((2, I, 4 * H), lambda g: (0, 0, 0)),          # w_ih (both dirs)
            pl.BlockSpec((2, H, 4 * H), lambda g: (0, 0, 0)),          # w_hh (both dirs)
            pl.BlockSpec((2, 1, 4 * H), lambda g: (0, 0, 0)),          # bias (both dirs)
        ],
        out_specs=[
            pl.BlockSpec((1, B, TB * H), lambda g: (g, 0, 0)),          # fwd out (lane-dense)
            pl.BlockSpec((1, B, TB * H), lambda g: (G - 1 - g, 0, 0)),  # bwd out (lane-dense)
            pl.BlockSpec((2 * B, H), lambda g: (0, 0)),                 # h_n
            pl.BlockSpec((2 * B, H), lambda g: (0, 0)),                 # c_n
        ],
        scratch_shapes=[
            pltpu.VMEM((2 * B, H), jnp.float32),           # h state  (fwd | bwd)
            pltpu.VMEM((2 * B, H), jnp.float32),           # c state  (fwd | bwd)
            pltpu.VMEM((B, TB, 4 * H), jnp.float32),       # hoisted x @ W_ih (fwd)
            pltpu.VMEM((B, TB, 4 * H), jnp.float32),       # hoisted x @ W_ih (bwd)
            pltpu.VMEM((B, TB * H), jnp.float32),          # fwd chunk out accumulator
            pltpu.VMEM((B, TB * H), jnp.float32),          # bwd chunk out accumulator
        ],
    )

    vmem_limit = _vmem_budget_bytes(B, TB, I, H, x.dtype.itemsize)

    out_f, out_b, hn, cn = pl.pallas_call(
        kernel,
        out_shape=(
            jax.ShapeDtypeStruct((G, B, TB * H), jnp.float32),
            jax.ShapeDtypeStruct((G, B, TB * H), jnp.float32),
            jax.ShapeDtypeStruct((2 * B, H), jnp.float32),
            jax.ShapeDtypeStruct((2 * B, H), jnp.float32),
        ),
        grid_spec=grid_spec,
        compiler_params=pltpu.CompilerParams(
            # single axis carries the recurrence (fwd+bwd are interleaved in-step)
            dimension_semantics=("arbitrary",),
            vmem_limit_bytes=vmem_limit),
    )(lens2d, x, x, w_ih, w_hh, bias)

    # Undo the lane packing (cheap wrapper reshape/transpose on a tiny array).
    def unpack(o):
        return (o.reshape(G, B, TB, H).transpose(0, 2, 1, 3)
                 .reshape(T_pad, B, H)[:max_length])

    output = jnp.concatenate([unpack(out_f), unpack(out_b)], axis=-1)

    # reduce_h_W / reduce_c_W on cat(h_fwd, h_bwd) / cat(c_fwd, c_bwd) -- tiny,
    # done in the wrapper.
    new_h = jnp.concatenate([hn[:B], hn[B:]], axis=-1) @ params["w_rh"] + params["b_rh"]
    new_c = jnp.concatenate([cn[:B], cn[B:]], axis=-1) @ params["w_rc"] + params["b_rc"]

    # context_mask[i, j] = 1 iff j < lens[i]
    context_mask = (jnp.arange(max_length)[None, :]
                    < jnp.asarray(input_lens)[:, None]).astype(jnp.int32)

    return output, context_mask, (new_h, new_c)


def rnn_encoder_reference(embedded_words, input_lens, params, hidden_size):
    """Pure-JAX reference (same bf16-rounded operands, f32 math, plain tanh)."""
    B, T, I = embedded_words.shape
    H = hidden_size
    x = jnp.transpose(embedded_words, (1, 0, 2)).astype(jnp.bfloat16).astype(jnp.float32)
    w_ih = params["w_ih"].astype(jnp.float32)
    w_hh = params["w_hh"].astype(jnp.float32)
    b = params["b"]
    lens = jnp.asarray(np.asarray(input_lens, np.int32)).reshape(B, 1)

    def cell(xt, h, c, d):
        hq = h.astype(jnp.bfloat16).astype(jnp.float32)
        gates = xt @ w_ih[d] + hq @ w_hh[d] + b[d]
        i = jax.nn.sigmoid(gates[:, 0 * H:1 * H])
        f = jax.nn.sigmoid(gates[:, 1 * H:2 * H])
        g = jnp.tanh(gates[:, 2 * H:3 * H])
        o = jax.nn.sigmoid(gates[:, 3 * H:4 * H])
        c2 = f * c + i * g
        return o * jnp.tanh(c2), c2

    h = jnp.zeros((B, H)); c = jnp.zeros((B, H)); out_f = []
    for t in range(T):
        h2, c2 = cell(x[t], h, c, 0)
        v = t < lens
        h = jnp.where(v, h2, h); c = jnp.where(v, c2, c)
        out_f.append(jnp.where(v, h2, 0.0))
    hf, cf = h, c
    h = jnp.zeros((B, H)); c = jnp.zeros((B, H)); out_b = [None] * T
    for t in range(T - 1, -1, -1):
        h2, c2 = cell(x[t], h, c, 1)
        v = t < lens
        h = jnp.where(v, h2, h); c = jnp.where(v, c2, c)
        out_b[t] = jnp.where(v, h2, 0.0)
    hb, cb = h, c
    output = jnp.concatenate([jnp.stack(out_f), jnp.stack(out_b)], axis=-1)
    new_h = jnp.concatenate([hf, hb], -1) @ params["w_rh"] + params["b_rh"]
    new_c = jnp.concatenate([cf, cb], -1) @ params["w_rc"] + params["b_rc"]
    return output, (new_h, new_c)


if __name__ == "__main__":
    # T=20 with time_block=8 -> TB=8, G=3, T_pad=24: exercises multi-chunk
    # recurrence, the reversed backward chunk walk and masked tail padding.
    B, T, I, H = 2, 20, 16, 32
    key = jax.random.PRNGKey(0)
    k_params, k_x = jax.random.split(key)

    params = init_params(k_params, I, H)
    embedded_words = jax.random.normal(k_x, (B, T, I), jnp.float32)
    # pack_padded_sequence requires lengths sorted descending; lens[0] == T
    input_lens = np.array([T, 13], dtype=np.int32)
    max_length = int(input_lens[0])

    output, context_mask, (new_h, new_c) = rnn_encoder_forward(
        embedded_words, input_lens, params, H, time_block=8)
    jax.block_until_ready((output, context_mask, new_h, new_c))

    assert output.shape == (max_length, B, 2 * H)
    assert context_mask.shape == (B, max_length)
    assert new_h.shape == (B, H) and new_c.shape == (B, H)

    # correctness check against a pure-JAX reference (sliced to max_length)
    ref_out, (ref_h, ref_c) = rnn_encoder_reference(embedded_words, input_lens, params, H)
    np.testing.assert_allclose(np.asarray(output), np.asarray(ref_out)[:max_length],
                               atol=1e-3, rtol=1e-3)
    np.testing.assert_allclose(np.asarray(new_h), np.asarray(ref_h), atol=1e-3, rtol=1e-3)
    np.testing.assert_allclose(np.asarray(new_c), np.asarray(ref_c), atol=1e-3, rtol=1e-3)

    print("KERNEL_OK")
</pallas_src>

<mosaic_0001>
module attributes {stable_mosaic.version = 11 : i64} {
  func.func @rnn_encoder_kernel(%arg0: i32, %arg1: memref<2x1xi32, #tpu.memory_space<vmem>>, %arg2: memref<2x8x16xf32, #tpu.memory_space<vmem>>, %arg3: memref<2x8x16xf32, #tpu.memory_space<vmem>>, %arg4: memref<2x16x128xbf16, #tpu.memory_space<vmem>>, %arg5: memref<2x32x128xbf16, #tpu.memory_space<vmem>>, %arg6: memref<2x1x128xf32, #tpu.memory_space<vmem>>, %arg7: memref<1x2x256xf32, #tpu.memory_space<vmem>>, %arg8: memref<1x2x256xf32, #tpu.memory_space<vmem>>, %arg9: memref<4x32xf32, #tpu.memory_space<vmem>>, %arg10: memref<4x32xf32, #tpu.memory_space<vmem>>, %arg11: memref<4x32xf32, #tpu.memory_space<vmem>>, %arg12: memref<4x32xf32, #tpu.memory_space<vmem>>, %arg13: memref<2x8x128xf32, #tpu.memory_space<vmem>>, %arg14: memref<2x8x128xf32, #tpu.memory_space<vmem>>, %arg15: memref<2x256xf32, #tpu.memory_space<vmem>>, %arg16: memref<2x256xf32, #tpu.memory_space<vmem>>) attributes {dimension_semantics = [#tpu.dimension_semantics<arbitrary>], iteration_bounds = array<i64: 3>, scalar_prefetch = 0 : i64, scratch_operands = 6 : i64, tpu.core_type = #tpu.core_type<tc>, window_params = [{pipeline_mode = #tpu.pipeline_mode<synchronous>, transform_indices = @transform_0, window_bounds = array<i64: 2, 1>}, {transform_indices = @transform_1, window_bounds = array<i64: 2, 8, 16>}, {transform_indices = @transform_2, window_bounds = array<i64: 2, 8, 16>}, {pipeline_mode = #tpu.pipeline_mode<synchronous>, transform_indices = @transform_3, window_bounds = array<i64: 2, 16, 128>}, {pipeline_mode = #tpu.pipeline_mode<synchronous>, transform_indices = @transform_4, window_bounds = array<i64: 2, 32, 128>}, {pipeline_mode = #tpu.pipeline_mode<synchronous>, transform_indices = @transform_5, window_bounds = array<i64: 2, 1, 128>}, {transform_indices = @transform_6, window_bounds = array<i64: 1, 2, 256>}, {transform_indices = @transform_7, window_bounds = array<i64: 1, 2, 256>}, {pipeline_mode = #tpu.pipeline_mode<synchronous>, transform_indices = @transform_8, window_bounds = array<i64: 4, 32>}, {pipeline_mode = #tpu.pipeline_mode<synchronous>, transform_indices = @transform_9, window_bounds = array<i64: 4, 32>}]} {
    %c0_i32 = arith.constant 0 : i32
    %0 = arith.cmpi eq, %arg0, %c0_i32 : i32
    %1 = arith.extui %0 : i1 to i32
    %c0_i32_0 = arith.constant 0 : i32
    %2 = arith.cmpi ne, %1, %c0_i32_0 : i32
    scf.if %2 {
      %cst_181 = arith.constant 0.000000e+00 : f32
      %470 = vector.broadcast %cst_181 : f32 to vector<4x32xf32>
      %c0_182 = arith.constant 0 : index
      %c0_183 = arith.constant 0 : index
      %471 = vector.load %arg11[%c0_182, %c0_183] : memref<4x32xf32, #tpu.memory_space<vmem>>, vector<4x32xf32>
      tpu.vector_store %arg11[%c0_182, %c0_183], %470 {strides = array<i32>} : memref<4x32xf32, #tpu.memory_space<vmem>>, vector<4x32xf32>,
      %cst_184 = arith.constant 0.000000e+00 : f32
      %472 = vector.broadcast %cst_184 : f32 to vector<4x32xf32>
      %c0_185 = arith.constant 0 : index
      %c0_186 = arith.constant 0 : index
      %473 = vector.load %arg12[%c0_185, %c0_186] : memref<4x32xf32, #tpu.memory_space<vmem>>, vector<4x32xf32>
      tpu.vector_store %arg12[%c0_185, %c0_186], %472 {strides = array<i32>} : memref<4x32xf32, #tpu.memory_space<vmem>>, vector<4x32xf32>,
    } else {
    }
    %c0 = arith.constant 0 : index
    %c0_1 = arith.constant 0 : index
    %c0_2 = arith.constant 0 : index
    %3 = vector.load %arg4[%c0, %c0_1, %c0_2] : memref<2x16x128xbf16, #tpu.memory_space<vmem>>, vector<1x16x128xbf16>
    %4 = vector.shape_cast %3 : vector<1x16x128xbf16> to vector<16x128xbf16>
    %c1 = arith.constant 1 : index
    %c0_3 = arith.constant 0 : index
    %c0_4 = arith.constant 0 : index
    %5 = vector.load %arg4[%c1, %c0_3, %c0_4] : memref<2x16x128xbf16, #tpu.memory_space<vmem>>, vector<1x16x128xbf16>
    %6 = vector.shape_cast %5 : vector<1x16x128xbf16> to vector<16x128xbf16>
    %c0_5 = arith.constant 0 : index
    %c0_6 = arith.constant 0 : index
    %c0_7 = arith.constant 0 : index
    %7 = vector.load %arg6[%c0_5, %c0_6, %c0_7] : memref<2x1x128xf32, #tpu.memory_space<vmem>>, vector<1x1x128xf32>
    %8 = vector.shape_cast %7 : vector<1x1x128xf32> to vector<1x128xf32>
    %c1_8 = arith.constant 1 : index
    %c0_9 = arith.constant 0 : index
    %c0_10 = arith.constant 0 : index
    %9 = vector.load %arg6[%c1_8, %c0_9, %c0_10] : memref<2x1x128xf32, #tpu.memory_space<vmem>>, vector<1x1x128xf32>
    %10 = vector.shape_cast %9 : vector<1x1x128xf32> to vector<1x128xf32>
    %c0_11 = arith.constant 0 : index
    %c0_12 = arith.constant 0 : index
    %c0_13 = arith.constant 0 : index
    %11 = vector.load %arg2[%c0_11, %c0_12, %c0_13] : memref<2x8x16xf32, #tpu.memory_space<vmem>>, vector<1x8x16xf32>
    %12 = vector.shape_cast %11 : vector<1x8x16xf32> to vector<8x16xf32>
    %13 = arith.truncf %12 : vector<8x16xf32> to vector<8x16xbf16>
    %cst = arith.constant dense<0.000000e+00> : vector<8x128xf32>
    %14 = tpu.matmul %13, %4, %cst {dimension_numbers = #tpu.dot_dimension_numbers<[1], [0], [0], [1], [0, 0, 1, 1], [], []>} : vector<8x16xbf16>, vector<16x128xbf16>, vector<8x128xf32> -> vector<8x128xf32>
    %15 = vector.broadcast %8 : vector<1x128xf32> to vector<8x128xf32>
    %16 = arith.addf %14, %15 : vector<8x128xf32>
    %c0_14 = arith.constant 0 : index
    %c0_15 = arith.constant 0 : index
    %c0_16 = arith.constant 0 : index
    %17 = vector.load %arg13[%c0_14, %c0_15, %c0_16] : memref<2x8x128xf32, #tpu.memory_space<vmem>>, vector<1x8x128xf32>
    %18 = vector.shape_cast %17 : vector<1x8x128xf32> to vector<8x128xf32>
    %19 = vector.shape_cast %16 : vector<8x128xf32> to vector<1x8x128xf32>
    tpu.vector_store %arg13[%c0_14, %c0_15, %c0_16], %19 {strides = array<i32>} : memref<2x8x128xf32, #tpu.memory_space<vmem>>, vector<1x8x128xf32>,
    %c0_17 = arith.constant 0 : index
    %c0_18 = arith.constant 0 : index
    %c0_19 = arith.constant 0 : index
    %20 = vector.load %arg3[%c0_17, %c0_18, %c0_19] : memref<2x8x16xf32, #tpu.memory_space<vmem>>, vector<1x8x16xf32>
    %21 = vector.shape_cast %20 : vector<1x8x16xf32> to vector<8x16xf32>
    %22 = arith.truncf %21 : vector<8x16xf32> to vector<8x16xbf16>
    %cst_20 = arith.constant dense<0.000000e+00> : vector<8x128xf32>
    %23 = tpu.matmul %22, %6, %cst_20 {dimension_numbers = #tpu.dot_dimension_numbers<[1], [0], [0], [1], [0, 0, 1, 1], [], []>} : vector<8x16xbf16>, vector<16x128xbf16>, vector<8x128xf32> -> vector<8x128xf32>
    %24 = vector.broadcast %10 : vector<1x128xf32> to vector<8x128xf32>
    %25 = arith.addf %23, %24 : vector<8x128xf32>
    %c0_21 = arith.constant 0 : index
    %c0_22 = arith.constant 0 : index
    %c0_23 = arith.constant 0 : index
    %26 = vector.load %arg14[%c0_21, %c0_22, %c0_23] : memref<2x8x128xf32, #tpu.memory_space<vmem>>, vector<1x8x128xf32>
    %27 = vector.shape_cast %26 : vector<1x8x128xf32> to vector<8x128xf32>
    %28 = vector.shape_cast %25 : vector<8x128xf32> to vector<1x8x128xf32>
    tpu.vector_store %arg14[%c0_21, %c0_22, %c0_23], %28 {strides = array<i32>} : memref<2x8x128xf32, #tpu.memory_space<vmem>>, vector<1x8x128xf32>,
    %c1_24 = arith.constant 1 : index
    %c0_25 = arith.constant 0 : index
    %c0_26 = arith.constant 0 : index
    %29 = vector.load %arg2[%c1_24, %c0_25, %c0_26] : memref<2x8x16xf32, #tpu.memory_space<vmem>>, vector<1x8x16xf32>
    %30 = vector.shape_cast %29 : vector<1x8x16xf32> to vector<8x16xf32>
    %31 = arith.truncf %30 : vector<8x16xf32> to vector<8x16xbf16>
    %cst_27 = arith.constant dense<0.000000e+00> : vector<8x128xf32>
    %32 = tpu.matmul %31, %4, %cst_27 {dimension_numbers = #tpu.dot_dimension_numbers<[1], [0], [0], [1], [0, 0, 1, 1], [], []>} : vector<8x16xbf16>, vector<16x128xbf16>, vector<8x128xf32> -> vector<8x128xf32>
    %33 = vector.broadcast %8 : vector<1x128xf32> to vector<8x128xf32>
    %34 = arith.addf %32, %33 : vector<8x128xf32>
    %c1_28 = arith.constant 1 : index
    %c0_29 = arith.constant 0 : index
    %c0_30 = arith.constant 0 : index
    %35 = vector.load %arg13[%c1_28, %c0_29, %c0_30] : memref<2x8x128xf32, #tpu.memory_space<vmem>>, vector<1x8x128xf32>
    %36 = vector.shape_cast %35 : vector<1x8x128xf32> to vector<8x128xf32>
    %37 = vector.shape_cast %34 : vector<8x128xf32> to vector<1x8x128xf32>
    tpu.vector_store %arg13[%c1_28, %c0_29, %c0_30], %37 {strides = array<i32>} : memref<2x8x128xf32, #tpu.memory_space<vmem>>, vector<1x8x128xf32>,
    %c1_31 = arith.constant 1 : index
    %c0_32 = arith.constant 0 : index
    %c0_33 = arith.constant 0 : index
    %38 = vector.load %arg3[%c1_31, %c0_32, %c0_33] : memref<2x8x16xf32, #tpu.memory_space<vmem>>, vector<1x8x16xf32>
    %39 = vector.shape_cast %38 : vector<1x8x16xf32> to vector<8x16xf32>
    %40 = arith.truncf %39 : vector<8x16xf32> to vector<8x16xbf16>
    %cst_34 = arith.constant dense<0.000000e+00> : vector<8x128xf32>
    %41 = tpu.matmul %40, %6, %cst_34 {dimension_numbers = #tpu.dot_dimension_numbers<[1], [0], [0], [1], [0, 0, 1, 1], [], []>} : vector<8x16xbf16>, vector<16x128xbf16>, vector<8x128xf32> -> vector<8x128xf32>
    %42 = vector.broadcast %10 : vector<1x128xf32> to vector<8x128xf32>
    %43 = arith.addf %41, %42 : vector<8x128xf32>
    %c1_35 = arith.constant 1 : index
    %c0_36 = arith.constant 0 : index
    %c0_37 = arith.constant 0 : index
    %44 = vector.load %arg14[%c1_35, %c0_36, %c0_37] : memref<2x8x128xf32, #tpu.memory_space<vmem>>, vector<1x8x128xf32>
    %45 = vector.shape_cast %44 : vector<1x8x128xf32> to vector<8x128xf32>
    %46 = vector.shape_cast %43 : vector<8x128xf32> to vector<1x8x128xf32>
    tpu.vector_store %arg14[%c1_35, %c0_36, %c0_37], %46 {strides = array<i32>} : memref<2x8x128xf32, #tpu.memory_space<vmem>>, vector<1x8x128xf32>,
    %c0_38 = arith.constant 0 : index
    %c0_39 = arith.constant 0 : index
    %c0_40 = arith.constant 0 : index
    %47 = vector.load %arg5[%c0_38, %c0_39, %c0_40] : memref<2x32x128xbf16, #tpu.memory_space<vmem>>, vector<1x32x128xbf16>
    %48 = vector.shape_cast %47 : vector<1x32x128xbf16> to vector<32x128xbf16>
    %c1_41 = arith.constant 1 : index
    %c0_42 = arith.constant 0 : index
    %c0_43 = arith.constant 0 : index
    %49 = vector.load %arg5[%c1_41, %c0_42, %c0_43] : memref<2x32x128xbf16, #tpu.memory_space<vmem>>, vector<1x32x128xbf16>
    %50 = vector.shape_cast %49 : vector<1x32x128xbf16> to vector<32x128xbf16>
    %c0_44 = arith.constant 0 : index
    %c0_45 = arith.constant 0 : index
    %51 = vector.load %arg1[%c0_44, %c0_45] : memref<2x1xi32, #tpu.memory_space<vmem>>, vector<2x1xi32>
    %52 = tpu.concatenate %51, %51 in 0 : vector<2x1xi32>, vector<2x1xi32> -> vector<4x1xi32>
    %53 = tpu.iota {dimensions = array<i32: 0>} : vector<4x1xi32>
    %c2_i32 = arith.constant 2 : i32
    %54 = vector.broadcast %c2_i32 : i32 to vector<4x1xi32>
    %55 = arith.cmpi slt, %53, %54 : vector<4x1xi32>
    %56 = tpu.iota {dimensions = array<i32: 1>} : vector<4x128xi32>
    %c64_i32 = arith.constant 64 : i32
    %57 = vector.broadcast %c64_i32 : i32 to vector<4x128xi32>
    %58 = arith.cmpi sge, %56, %57 : vector<4x128xi32>
    %c96_i32 = arith.constant 96 : i32
    %59 = vector.broadcast %c96_i32 : i32 to vector<4x128xi32>
    %60 = arith.cmpi slt, %56, %59 : vector<4x128xi32>
    %61 = arith.andi %58, %60 : vector<4x128xi1>
    %cst_46 = arith.constant 2.000000e+00 : f32
    %cst_47 = arith.constant 1.000000e+00 : f32
    %62 = vector.broadcast %cst_46 : f32 to vector<4x128xf32>
    %63 = vector.broadcast %cst_47 : f32 to vector<4x128xf32>
    %64 = arith.select %61, %62, %63 : vector<4x128xi1>, vector<4x128xf32>
    %cst_48 = arith.constant -1.000000e+00 : f32
    %cst_49 = arith.constant 0.000000e+00 : f32
    %65 = vector.broadcast %cst_48 : f32 to vector<4x128xf32>
    %66 = vector.broadcast %cst_49 : f32 to vector<4x128xf32>
    %67 = arith.select %61, %65, %66 : vector<4x128xi1>, vector<4x128xf32>
    %c8_i32 = arith.constant 8 : i32
    %68 = arith.muli %arg0, %c8_i32 : i32
    %c2_i32_50 = arith.constant 2 : i32
    %69 = arith.subi %c2_i32_50, %arg0 : i32
    %c8_i32_51 = arith.constant 8 : i32
    %70 = arith.muli %69, %c8_i32_51 : i32
    %c0_52 = arith.constant 0 : index
    %c0_53 = arith.constant 0 : index
    %71 = vector.load %arg11[%c0_52, %c0_53] : memref<4x32xf32, #tpu.memory_space<vmem>>, vector<4x32xf32>
    %c0_54 = arith.constant 0 : index
    %c0_55 = arith.constant 0 : index
    %72 = vector.load %arg12[%c0_54, %c0_55] : memref<4x32xf32, #tpu.memory_space<vmem>>, vector<4x32xf32>
    %73 = arith.truncf %71 : vector<4x32xf32> to vector<4x32xbf16>
    %c0_56 = arith.constant 0 : index
    %c0_57 = arith.constant 0 : index
    %c0_58 = arith.constant 0 : index
    %74 = vector.load %arg13[%c0_56, %c0_57, %c0_58] : memref<2x8x128xf32, #tpu.memory_space<vmem>>, vector<2x1x128xf32>
    %75 = vector.shape_cast %74 : vector<2x1x128xf32> to vector<2x128xf32>
    %76 = vector.extract_strided_slice %73 {offsets = [0, 0], sizes = [2, 32], strides = [1, 1]} : vector<4x32xbf16> to vector<2x32xbf16>
    %cst_59 = arith.constant dense<0.000000e+00> : vector<2x128xf32>
    %77 = tpu.matmul %76, %48, %cst_59 {dimension_numbers = #tpu.dot_dimension_numbers<[1], [0], [0], [1], [0, 0, 1, 1], [], []>} : vector<2x32xbf16>, vector<32x128xbf16>, vector<2x128xf32> -> vector<2x128xf32>
    %78 = arith.addf %75, %77 : vector<2x128xf32>
    %c0_60 = arith.constant 0 : index
    %c7 = arith.constant 7 : index
    %c0_61 = arith.constant 0 : index
    %79 = vector.load %arg14[%c0_60, %c7, %c0_61] : memref<2x8x128xf32, #tpu.memory_space<vmem>>, vector<2x1x128xf32>
    %80 = vector.shape_cast %79 : vector<2x1x128xf32> to vector<2x128xf32>
    %81 = vector.extract_strided_slice %73 {offsets = [2, 0], sizes = [2, 32], strides = [1, 1]} : vector<4x32xbf16> to vector<2x32xbf16>
    %cst_62 = arith.constant dense<0.000000e+00> : vector<2x128xf32>
    %82 = tpu.matmul %81, %50, %cst_62 {dimension_numbers = #tpu.dot_dimension_numbers<[1], [0], [0], [1], [0, 0, 1, 1], [], []>} : vector<2x32xbf16>, vector<32x128xbf16>, vector<2x128xf32> -> vector<2x128xf32>
    %83 = arith.addf %80, %82 : vector<2x128xf32>
    %84 = tpu.concatenate %78, %83 in 0 : vector<2x128xf32>, vector<2x128xf32> -> vector<4x128xf32>
    %85 = arith.negf %84 : vector<4x128xf32>
    %86 = math.exp %85 : vector<4x128xf32>
    %cst_63 = arith.constant 1.000000e+00 : f32
    %87 = vector.broadcast %cst_63 : f32 to vector<4x128xf32>
    %88 = arith.addf %87, %86 : vector<4x128xf32>
    %89 = arith.divf %87, %88 : vector<4x128xf32>
    %90 = arith.mulf %89, %64 : vector<4x128xf32>
    %91 = arith.addf %90, %67 : vector<4x128xf32>
    %92 = vector.extract_strided_slice %91 {offsets = [0, 0], sizes = [4, 32], strides = [1, 1]} : vector<4x128xf32> to vector<4x32xf32>
    %93 = vector.extract_strided_slice %91 {offsets = [0, 32], sizes = [4, 32], strides = [1, 1]} : vector<4x128xf32> to vector<4x32xf32>
    %94 = vector.extract_strided_slice %91 {offsets = [0, 64], sizes = [4, 32], strides = [1, 1]} : vector<4x128xf32> to vector<4x32xf32>
    %95 = vector.extract_strided_slice %91 {offsets = [0, 96], sizes = [4, 32], strides = [1, 1]} : vector<4x128xf32> to vector<4x32xf32>
    %96 = arith.mulf %93, %72 : vector<4x32xf32>
    %97 = arith.mulf %92, %94 : vector<4x32xf32>
    %98 = arith.addf %96, %97 : vector<4x32xf32>
    %99 = math.tanh %98 : vector<4x32xf32>
    %100 = arith.mulf %95, %99 : vector<4x32xf32>
    %c0_i32_64 = arith.constant 0 : i32
    %101 = arith.addi %68, %c0_i32_64 : i32
    %c7_i32 = arith.constant 7 : i32
    %102 = arith.addi %70, %c7_i32 : i32
    %103 = vector.broadcast %101 : i32 to vector<4x1xi32>
    %104 = vector.broadcast %102 : i32 to vector<4x1xi32>
    %105 = arith.select %55, %103, %104 : vector<4x1xi1>, vector<4x1xi32>
    %106 = arith.cmpi slt, %105, %52 : vector<4x1xi32>
    %107 = vector.shape_cast %106 : vector<4x1xi1> to vector<4x1xi1>
    %108 = vector.broadcast %107 : vector<4x1xi1> to vector<4x32xi1>
    %109 = arith.select %108, %100, %71 : vector<4x32xi1>, vector<4x32xf32>
    %110 = vector.shape_cast %106 : vector<4x1xi1> to vector<4x1xi1>
    %111 = vector.broadcast %110 : vector<4x1xi1> to vector<4x32xi1>
    %112 = arith.select %111, %98, %72 : vector<4x32xi1>, vector<4x32xf32>
    %cst_65 = arith.constant 0.000000e+00 : f32
    %113 = vector.shape_cast %106 : vector<4x1xi1> to vector<4x1xi1>
    %114 = vector.broadcast %113 : vector<4x1xi1> to vector<4x32xi1>
    %115 = vector.broadcast %cst_65 : f32 to vector<4x32xf32>
    %116 = arith.select %114, %100, %115 : vector<4x32xi1>, vector<4x32xf32>
    %117 = vector.extract_strided_slice %116 {offsets = [0, 0], sizes = [2, 32], strides = [1, 1]} : vector<4x32xf32> to vector<2x32xf32>
    %c0_66 = arith.constant 0 : index
    %c0_67 = arith.constant 0 : index
    %118 = vector.load %arg15[%c0_66, %c0_67] : memref<2x256xf32, #tpu.memory_space<vmem>>, vector<2x32xf32>
    tpu.vector_store %arg15[%c0_66, %c0_67], %117 {strides = array<i32>} : memref<2x256xf32, #tpu.memory_space<vmem>>, vector<2x32xf32>,
    %119 = vector.extract_strided_slice %116 {offsets = [2, 0], sizes = [2, 32], strides = [1, 1]} : vector<4x32xf32> to vector<2x32xf32>
    %c0_68 = arith.constant 0 : index
    %c224 = arith.constant 224 : index
    %120 = vector.load %arg16[%c0_68, %c224] : memref<2x256xf32, #tpu.memory_space<vmem>>, vector<2x32xf32>
    tpu.vector_store %arg16[%c0_68, %c224], %119 {strides = array<i32>} : memref<2x256xf32, #tpu.memory_space<vmem>>, vector<2x32xf32>,
    %121 = arith.truncf %109 : vector<4x32xf32> to vector<4x32xbf16>
    %c0_69 = arith.constant 0 : index
    %c1_70 = arith.constant 1 : index
    %c0_71 = arith.constant 0 : index
    %122 = vector.load %arg13[%c0_69, %c1_70, %c0_71] : memref<2x8x128xf32, #tpu.memory_space<vmem>>, vector<2x1x128xf32>
    %123 = vector.shape_cast %122 : vector<2x1x128xf32> to vector<2x128xf32>
    %124 = vector.extract_strided_slice %121 {offsets = [0, 0], sizes = [2, 32], strides = [1, 1]} : vector<4x32xbf16> to vector<2x32xbf16>
    %cst_72 = arith.constant dense<0.000000e+00> : vector<2x128xf32>
    %125 = tpu.matmul %124, %48, %cst_72 {dimension_numbers = #tpu.dot_dimension_numbers<[1], [0], [0], [1], [0, 0, 1, 1], [], []>} : vector<2x32xbf16>, vector<32x128xbf16>, vector<2x128xf32> -> vector<2x128xf32>
    %126 = arith.addf %123, %125 : vector<2x128xf32>
    %c0_73 = arith.constant 0 : index
    %c6 = arith.constant 6 : index
    %c0_74 = arith.constant 0 : index
    %127 = vector.load %arg14[%c0_73, %c6, %c0_74] : memref<2x8x128xf32, #tpu.memory_space<vmem>>, vector<2x1x128xf32>
    %128 = vector.shape_cast %127 : vector<2x1x128xf32> to vector<2x128xf32>
    %129 = vector.extract_strided_slice %121 {offsets = [2, 0], sizes = [2, 32], strides = [1, 1]} : vector<4x32xbf16> to vector<2x32xbf16>
    %cst_75 = arith.constant dense<0.000000e+00> : vector<2x128xf32>
    %130 = tpu.matmul %129, %50, %cst_75 {dimension_numbers = #tpu.dot_dimension_numbers<[1], [0], [0], [1], [0, 0, 1, 1], [], []>} : vector<2x32xbf16>, vector<32x128xbf16>, vector<2x128xf32> -> vector<2x128xf32>
    %131 = arith.addf %128, %130 : vector<2x128xf32>
    %132 = tpu.concatenate %126, %131 in 0 : vector<2x128xf32>, vector<2x128xf32> -> vector<4x128xf32>
    %133 = arith.negf %132 : vector<4x128xf32>
    %134 = math.exp %133 : vector<4x128xf32>
    %cst_76 = arith.constant 1.000000e+00 : f32
    %135 = vector.broadcast %cst_76 : f32 to vector<4x128xf32>
    %136 = arith.addf %135, %134 : vector<4x128xf32>
    %137 = arith.divf %135, %136 : vector<4x128xf32>
    %138 = arith.mulf %137, %64 : vector<4x128xf32>
    %139 = arith.addf %138, %67 : vector<4x128xf32>
    %140 = vector.extract_strided_slice %139 {offsets = [0, 0], sizes = [4, 32], strides = [1, 1]} : vector<4x128xf32> to vector<4x32xf32>
    %141 = vector.extract_strided_slice %139 {offsets = [0, 32], sizes = [4, 32], strides = [1, 1]} : vector<4x128xf32> to vector<4x32xf32>
    %142 = vector.extract_strided_slice %139 {offsets = [0, 64], sizes = [4, 32], strides = [1, 1]} : vector<4x128xf32> to vector<4x32xf32>
    %143 = vector.extract_strided_slice %139 {offsets = [0, 96], sizes = [4, 32], strides = [1, 1]} : vector<4x128xf32> to vector<4x32xf32>
    %144 = arith.mulf %141, %112 : vector<4x32xf32>
    %145 = arith.mulf %140, %142 : vector<4x32xf32>
    %146 = arith.addf %144, %145 : vector<4x32xf32>
    %147 = math.tanh %146 : vector<4x32xf32>
    %148 = arith.mulf %143, %147 : vector<4x32xf32>
    %c1_i32 = arith.constant 1 : i32
    %149 = arith.addi %68, %c1_i32 : i32
    %c6_i32 = arith.constant 6 : i32
    %150 = arith.addi %70, %c6_i32 : i32
    %151 = vector.broadcast %149 : i32 to vector<4x1xi32>
    %152 = vector.broadcast %150 : i32 to vector<4x1xi32>
    %153 = arith.select %55, %151, %152 : vector<4x1xi1>, vector<4x1xi32>
    %154 = arith.cmpi slt, %153, %52 : vector<4x1xi32>
    %155 = vector.shape_cast %154 : vector<4x1xi1> to vector<4x1xi1>
    %156 = vector.broadcast %155 : vector<4x1xi1> to vector<4x32xi1>
    %157 = arith.select %156, %148, %109 : vector<4x32xi1>, vector<4x32xf32>
    %158 = vector.shape_cast %154 : vector<4x1xi1> to vector<4x1xi1>
    %159 = vector.broadcast %158 : vector<4x1xi1> to vector<4x32xi1>
    %160 = arith.select %159, %146, %112 : vector<4x32xi1>, vector<4x32xf32>
    %cst_77 = arith.constant 0.000000e+00 : f32
    %161 = vector.shape_cast %154 : vector<4x1xi1> to vector<4x1xi1>
    %162 = vector.broadcast %161 : vector<4x1xi1> to vector<4x32xi1>
    %163 = vector.broadcast %cst_77 : f32 to vector<4x32xf32>
    %164 = arith.select %162, %148, %163 : vector<4x32xi1>, vector<4x32xf32>
    %165 = vector.extract_strided_slice %164 {offsets = [0, 0], sizes = [2, 32], strides = [1, 1]} : vector<4x32xf32> to vector<2x32xf32>
    %c0_78 = arith.constant 0 : index
    %c32 = arith.constant 32 : index
    %166 = vector.load %arg15[%c0_78, %c32] : memref<2x256xf32, #tpu.memory_space<vmem>>, vector<2x32xf32>
    tpu.vector_store %arg15[%c0_78, %c32], %165 {strides = array<i32>} : memref<2x256xf32, #tpu.memory_space<vmem>>, vector<2x32xf32>,
    %167 = vector.extract_strided_slice %164 {offsets = [2, 0], sizes = [2, 32], strides = [1, 1]} : vector<4x32xf32> to vector<2x32xf32>
    %c0_79 = arith.constant 0 : index
    %c192 = arith.constant 192 : index
    %168 = vector.load %arg16[%c0_79, %c192] : memref<2x256xf32, #tpu.memory_space<vmem>>, vector<2x32xf32>
    tpu.vector_store %arg16[%c0_79, %c192], %167 {strides = array<i32>} : memref<2x256xf32, #tpu.memory_space<vmem>>, vector<2x32xf32>,
    %169 = arith.truncf %157 : vector<4x32xf32> to vector<4x32xbf16>
    %c0_80 = arith.constant 0 : index
    %c2 = arith.constant 2 : index
    %c0_81 = arith.constant 0 : index
    %170 = vector.load %arg13[%c0_80, %c2, %c0_81] : memref<2x8x128xf32, #tpu.memory_space<vmem>>, vector<2x1x128xf32>
    %171 = vector.shape_cast %170 : vector<2x1x128xf32> to vector<2x128xf32>
    %172 = vector.extract_strided_slice %169 {offsets = [0, 0], sizes = [2, 32], strides = [1, 1]} : vector<4x32xbf16> to vector<2x32xbf16>
    %cst_82 = arith.constant dense<0.000000e+00> : vector<2x128xf32>
    %173 = tpu.matmul %172, %48, %cst_82 {dimension_numbers = #tpu.dot_dimension_numbers<[1], [0], [0], [1], [0, 0, 1, 1], [], []>} : vector<2x32xbf16>, vector<32x128xbf16>, vector<2x128xf32> -> vector<2x128xf32>
    %174 = arith.addf %171, %173 : vector<2x128xf32>
    %c0_83 = arith.constant 0 : index
    %c5 = arith.constant 5 : index
    %c0_84 = arith.constant 0 : index
    %175 = vector.load %arg14[%c0_83, %c5, %c0_84] : memref<2x8x128xf32, #tpu.memory_space<vmem>>, vector<2x1x128xf32>
    %176 = vector.shape_cast %175 : vector<2x1x128xf32> to vector<2x128xf32>
    %177 = vector.extract_strided_slice %169 {offsets = [2, 0], sizes = [2, 32], strides = [1, 1]} : vector<4x32xbf16> to vector<2x32xbf16>
    %cst_85 = arith.constant dense<0.000000e+00> : vector<2x128xf32>
    %178 = tpu.matmul %177, %50, %cst_85 {dimension_numbers = #tpu.dot_dimension_numbers<[1], [0], [0], [1], [0, 0, 1, 1], [], []>} : vector<2x32xbf16>, vector<32x128xbf16>, vector<2x128xf32> -> vector<2x128xf32>
    %179 = arith.addf %176, %178 : vector<2x128xf32>
    %180 = tpu.concatenate %174, %179 in 0 : vector<2x128xf32>, vector<2x128xf32> -> vector<4x128xf32>
    %181 = arith.negf %180 : vector<4x128xf32>
    %182 = math.exp %181 : vector<4x128xf32>
    %cst_86 = arith.constant 1.000000e+00 : f32
    %183 = vector.broadcast %cst_86 : f32 to vector<4x128xf32>
    %184 = arith.addf %183, %182 : vector<4x128xf32>
    %185 = arith.divf %183, %184 : vector<4x128xf32>
    %186 = arith.mulf %185, %64 : vector<4x128xf32>
    %187 = arith.addf %186, %67 : vector<4x128xf32>
    %188 = vector.extract_strided_slice %187 {offsets = [0, 0], sizes = [4, 32], strides = [1, 1]} : vector<4x128xf32> to vector<4x32xf32>
    %189 = vector.extract_strided_slice %187 {offsets = [0, 32], sizes = [4, 32], strides = [1, 1]} : vector<4x128xf32> to vector<4x32xf32>
    %190 = vector.extract_strided_slice %187 {offsets = [0, 64], sizes = [4, 32], strides = [1, 1]} : vector<4x128xf32> to vector<4x32xf32>
    %191 = vector.extract_strided_slice %187 {offsets = [0, 96], sizes = [4, 32], strides = [1, 1]} : vector<4x128xf32> to vector<4x32xf32>
    %192 = arith.mulf %189, %160 : vector<4x32xf32>
    %193 = arith.mulf %188, %190 : vector<4x32xf32>
    %194 = arith.addf %192, %193 : vector<4x32xf32>
    %195 = math.tanh %194 : vector<4x32xf32>
    %196 = arith.mulf %191, %195 : vector<4x32xf32>
    %c2_i32_87 = arith.constant 2 : i32
    %197 = arith.addi %68, %c2_i32_87 : i32
    %c5_i32 = arith.constant 5 : i32
    %198 = arith.addi %70, %c5_i32 : i32
    %199 = vector.broadcast %197 : i32 to vector<4x1xi32>
    %200 = vector.broadcast %198 : i32 to vector<4x1xi32>
    %201 = arith.select %55, %199, %200 : vector<4x1xi1>, vector<4x1xi32>
    %202 = arith.cmpi slt, %201, %52 : vector<4x1xi32>
    %203 = vector.shape_cast %202 : vector<4x1xi1> to vector<4x1xi1>
    %204 = vector.broadcast %203 : vector<4x1xi1> to vector<4x32xi1>
    %205 = arith.select %204, %196, %157 : vector<4x32xi1>, vector<4x32xf32>
    %206 = vector.shape_cast %202 : vector<4x1xi1> to vector<4x1xi1>
    %207 = vector.broadcast %206 : vector<4x1xi1> to vector<4x32xi1>
    %208 = arith.select %207, %194, %160 : vector<4x32xi1>, vector<4x32xf32>
    %cst_88 = arith.constant 0.000000e+00 : f32
    %209 = vector.shape_cast %202 : vector<4x1xi1> to vector<4x1xi1>
    %210 = vector.broadcast %209 : vector<4x1xi1> to vector<4x32xi1>
    %211 = vector.broadcast %cst_88 : f32 to vector<4x32xf32>
    %212 = arith.select %210, %196, %211 : vector<4x32xi1>, vector<4x32xf32>
    %213 = vector.extract_strided_slice %212 {offsets = [0, 0], sizes = [2, 32], strides = [1, 1]} : vector<4x32xf32> to vector<2x32xf32>
    %c0_89 = arith.constant 0 : index
    %c64 = arith.constant 64 : index
    %214 = vector.load %arg15[%c0_89, %c64] : memref<2x256xf32, #tpu.memory_space<vmem>>, vector<2x32xf32>
    tpu.vector_store %arg15[%c0_89, %c64], %213 {strides = array<i32>} : memref<2x256xf32, #tpu.memory_space<vmem>>, vector<2x32xf32>,
    %215 = vector.extract_strided_slice %212 {offsets = [2, 0], sizes = [2, 32], strides = [1, 1]} : vector<4x32xf32> to vector<2x32xf32>
    %c0_90 = arith.constant 0 : index
    %c160 = arith.constant 160 : index
    %216 = vector.load %arg16[%c0_90, %c160] : memref<2x256xf32, #tpu.memory_space<vmem>>, vector<2x32xf32>
    tpu.vector_store %arg16[%c0_90, %c160], %215 {strides = array<i32>} : memref<2x256xf32, #tpu.memory_space<vmem>>, vector<2x32xf32>,
    %217 = arith.truncf %205 : vector<4x32xf32> to vector<4x32xbf16>
    %c0_91 = arith.constant 0 : index
    %c3 = arith.constant 3 : index
    %c0_92 = arith.constant 0 : index
    %218 = vector.load %arg13[%c0_91, %c3, %c0_92] : memref<2x8x128xf32, #tpu.memory_space<vmem>>, vector<2x1x128xf32>
    %219 = vector.shape_cast %218 : vector<2x1x128xf32> to vector<2x128xf32>
    %220 = vector.extract_strided_slice %217 {offsets = [0, 0], sizes = [2, 32], strides = [1, 1]} : vector<4x32xbf16> to vector<2x32xbf16>
    %cst_93 = arith.constant dense<0.000000e+00> : vector<2x128xf32>
    %221 = tpu.matmul %220, %48, %cst_93 {dimension_numbers = #tpu.dot_dimension_numbers<[1], [0], [0], [1], [0, 0, 1, 1], [], []>} : vector<2x32xbf16>, vector<32x128xbf16>, vector<2x128xf32> -> vector<2x128xf32>
    %222 = arith.addf %219, %221 : vector<2x128xf32>
    %c0_94 = arith.constant 0 : index
    %c4 = arith.constant 4 : index
    %c0_95 = arith.constant 0 : index
    %223 = vector.load %arg14[%c0_94, %c4, %c0_95] : memref<2x8x128xf32, #tpu.memory_space<vmem>>, vector<2x1x128xf32>
    %224 = vector.shape_cast %223 : vector<2x1x128xf32> to vector<2x128xf32>
    %225 = vector.extract_strided_slice %217 {offsets = [2, 0], sizes = [2, 32], strides = [1, 1]} : vector<4x32xbf16> to vector<2x32xbf16>
    %cst_96 = arith.constant dense<0.000000e+00> : vector<2x128xf32>
    %226 = tpu.matmul %225, %50, %cst_96 {dimension_numbers = #tpu.dot_dimension_numbers<[1], [0], [0], [1], [0, 0, 1, 1], [], []>} : vector<2x32xbf16>, vector<32x128xbf16>, vector<2x128xf32> -> vector<2x128xf32>
    %227 = arith.addf %224, %226 : vector<2x128xf32>
    %228 = tpu.concatenate %222, %227 in 0 : vector<2x128xf32>, vector<2x128xf32> -> vector<4x128xf32>
    %229 = arith.negf %228 : vector<4x128xf32>
    %230 = math.exp %229 : vector<4x128xf32>
    %cst_97 = arith.constant 1.000000e+00 : f32
    %231 = vector.broadcast %cst_97 : f32 to vector<4x128xf32>
    %232 = arith.addf %231, %230 : vector<4x128xf32>
    %233 = arith.divf %231, %232 : vector<4x128xf32>
    %234 = arith.mulf %233, %64 : vector<4x128xf32>
    %235 = arith.addf %234, %67 : vector<4x128xf32>
    %236 = vector.extract_strided_slice %235 {offsets = [0, 0], sizes = [4, 32], strides = [1, 1]} : vector<4x128xf32> to vector<4x32xf32>
    %237 = vector.extract_strided_slice %235 {offsets = [0, 32], sizes = [4, 32], strides = [1, 1]} : vector<4x128xf32> to vector<4x32xf32>
    %238 = vector.extract_strided_slice %235 {offsets = [0, 64], sizes = [4, 32], strides = [1, 1]} : vector<4x128xf32> to vector<4x32xf32>
    %239 = vector.extract_strided_slice %235 {offsets = [0, 96], sizes = [4, 32], strides = [1, 1]} : vector<4x128xf32> to vector<4x32xf32>
    %240 = arith.mulf %237, %208 : vector<4x32xf32>
    %241 = arith.mulf %236, %238 : vector<4x32xf32>
    %242 = arith.addf %240, %241 : vector<4x32xf32>
    %243 = math.tanh %242 : vector<4x32xf32>
    %244 = arith.mulf %239, %243 : vector<4x32xf32>
    %c3_i32 = arith.constant 3 : i32
    %245 = arith.addi %68, %c3_i32 : i32
    %c4_i32 = arith.constant 4 : i32
    %246 = arith.addi %70, %c4_i32 : i32
    %247 = vector.broadcast %245 : i32 to vector<4x1xi32>
    %248 = vector.broadcast %246 : i32 to vector<4x1xi32>
    %249 = arith.select %55, %247, %248 : vector<4x1xi1>, vector<4x1xi32>
    %250 = arith.cmpi slt, %249, %52 : vector<4x1xi32>
    %251 = vector.shape_cast %250 : vector<4x1xi1> to vector<4x1xi1>
    %252 = vector.broadcast %251 : vector<4x1xi1> to vector<4x32xi1>
    %253 = arith.select %252, %244, %205 : vector<4x32xi1>, vector<4x32xf32>
    %254 = vector.shape_cast %250 : vector<4x1xi1> to vector<4x1xi1>
    %255 = vector.broadcast %254 : vector<4x1xi1> to vector<4x32xi1>
    %256 = arith.select %255, %242, %208 : vector<4x32xi1>, vector<4x32xf32>
    %cst_98 = arith.constant 0.000000e+00 : f32
    %257 = vector.shape_cast %250 : vector<4x1xi1> to vector<4x1xi1>
    %258 = vector.broadcast %257 : vector<4x1xi1> to vector<4x32xi1>
    %259 = vector.broadcast %cst_98 : f32 to vector<4x32xf32>
    %260 = arith.select %258, %244, %259 : vector<4x32xi1>, vector<4x32xf32>
    %261 = vector.extract_strided_slice %260 {offsets = [0, 0], sizes = [2, 32], strides = [1, 1]} : vector<4x32xf32> to vector<2x32xf32>
    %c0_99 = arith.constant 0 : index
    %c96 = arith.constant 96 : index
    %262 = vector.load %arg15[%c0_99, %c96] : memref<2x256xf32, #tpu.memory_space<vmem>>, vector<2x32xf32>
    tpu.vector_store %arg15[%c0_99, %c96], %261 {strides = array<i32>} : memref<2x256xf32, #tpu.memory_space<vmem>>, vector<2x32xf32>,
    %263 = vector.extract_strided_slice %260 {offsets = [2, 0], sizes = [2, 32], strides = [1, 1]} : vector<4x32xf32> to vector<2x32xf32>
    %c0_100 = arith.constant 0 : index
    %c128 = arith.constant 128 : index
    %264 = vector.load %arg16[%c0_100, %c128] : memref<2x256xf32, #tpu.memory_space<vmem>>, vector<2x32xf32>
    tpu.vector_store %arg16[%c0_100, %c128], %263 {strides = array<i32>} : memref<2x256xf32, #tpu.memory_space<vmem>>, vector<2x32xf32>,
    %265 = arith.truncf %253 : vector<4x32xf32> to vector<4x32xbf16>
    %c0_101 = arith.constant 0 : index
    %c4_102 = arith.constant 4 : index
    %c0_103 = arith.constant 0 : index
    %266 = vector.load %arg13[%c0_101, %c4_102, %c0_103] : memref<2x8x128xf32, #tpu.memory_space<vmem>>, vector<2x1x128xf32>
    %267 = vector.shape_cast %266 : vector<2x1x128xf32> to vector<2x128xf32>
    %268 = vector.extract_strided_slice %265 {offsets = [0, 0], sizes = [2, 32], strides = [1, 1]} : vector<4x32xbf16> to vector<2x32xbf16>
    %cst_104 = arith.constant dense<0.000000e+00> : vector<2x128xf32>
    %269 = tpu.matmul %268, %48, %cst_104 {dimension_numbers = #tpu.dot_dimension_numbers<[1], [0], [0], [1], [0, 0, 1, 1], [], []>} : vector<2x32xbf16>, vector<32x128xbf16>, vector<2x128xf32> -> vector<2x128xf32>
    %270 = arith.addf %267, %269 : vector<2x128xf32>
    %c0_105 = arith.constant 0 : index
    %c3_106 = arith.constant 3 : index
    %c0_107 = arith.constant 0 : index
    %271 = vector.load %arg14[%c0_105, %c3_106, %c0_107] : memref<2x8x128xf32, #tpu.memory_space<vmem>>, vector<2x1x128xf32>
    %272 = vector.shape_cast %271 : vector<2x1x128xf32> to vector<2x128xf32>
    %273 = vector.extract_strided_slice %265 {offsets = [2, 0], sizes = [2, 32], strides = [1, 1]} : vector<4x32xbf16> to vector<2x32xbf16>
    %cst_108 = arith.constant dense<0.000000e+00> : vector<2x128xf32>
    %274 = tpu.matmul %273, %50, %cst_108 {dimension_numbers = #tpu.dot_dimension_numbers<[1], [0], [0], [1], [0, 0, 1, 1], [], []>} : vector<2x32xbf16>, vector<32x128xbf16>, vector<2x128xf32> -> vector<2x128xf32>
    %275 = arith.addf %272, %274 : vector<2x128xf32>
    %276 = tpu.concatenate %270, %275 in 0 : vector<2x128xf32>, vector<2x128xf32> -> vector<4x128xf32>
    %277 = arith.negf %276 : vector<4x128xf32>
    %278 = math.exp %277 : vector<4x128xf32>
    %cst_109 = arith.constant 1.000000e+00 : f32
    %279 = vector.broadcast %cst_109 : f32 to vector<4x128xf32>
    %280 = arith.addf %279, %278 : vector<4x128xf32>
    %281 = arith.divf %279, %280 : vector<4x128xf32>
    %282 = arith.mulf %281, %64 : vector<4x128xf32>
    %283 = arith.addf %282, %67 : vector<4x128xf32>
    %284 = vector.extract_strided_slice %283 {offsets = [0, 0], sizes = [4, 32], strides = [1, 1]} : vector<4x128xf32> to vector<4x32xf32>
    %285 = vector.extract_strided_slice %283 {offsets = [0, 32], sizes = [4, 32], strides = [1, 1]} : vector<4x128xf32> to vector<4x32xf32>
    %286 = vector.extract_strided_slice %283 {offsets = [0, 64], sizes = [4, 32], strides = [1, 1]} : vector<4x128xf32> to vector<4x32xf32>
    %287 = vector.extract_strided_slice %283 {offsets = [0, 96], sizes = [4, 32], strides = [1, 1]} : vector<4x128xf32> to vector<4x32xf32>
    %288 = arith.mulf %285, %256 : vector<4x32xf32>
    %289 = arith.mulf %284, %286 : vector<4x32xf32>
    %290 = arith.addf %288, %289 : vector<4x32xf32>
    %291 = math.tanh %290 : vector<4x32xf32>
    %292 = arith.mulf %287, %291 : vector<4x32xf32>
    %c4_i32_110 = arith.constant 4 : i32
    %293 = arith.addi %68, %c4_i32_110 : i32
    %c3_i32_111 = arith.constant 3 : i32
    %294 = arith.addi %70, %c3_i32_111 : i32
    %295 = vector.broadcast %293 : i32 to vector<4x1xi32>
    %296 = vector.broadcast %294 : i32 to vector<4x1xi32>
    %297 = arith.select %55, %295, %296 : vector<4x1xi1>, vector<4x1xi32>
    %298 = arith.cmpi slt, %297, %52 : vector<4x1xi32>
    %299 = vector.shape_cast %298 : vector<4x1xi1> to vector<4x1xi1>
    %300 = vector.broadcast %299 : vector<4x1xi1> to vector<4x32xi1>
    %301 = arith.select %300, %292, %253 : vector<4x32xi1>, vector<4x32xf32>
    %302 = vector.shape_cast %298 : vector<4x1xi1> to vector<4x1xi1>
    %303 = vector.broadcast %302 : vector<4x1xi1> to vector<4x32xi1>
    %304 = arith.select %303, %290, %256 : vector<4x32xi1>, vector<4x32xf32>
    %cst_112 = arith.constant 0.000000e+00 : f32
    %305 = vector.shape_cast %298 : vector<4x1xi1> to vector<4x1xi1>
    %306 = vector.broadcast %305 : vector<4x1xi1> to vector<4x32xi1>
    %307 = vector.broadcast %cst_112 : f32 to vector<4x32xf32>
    %308 = arith.select %306, %292, %307 : vector<4x32xi1>, vector<4x32xf32>
    %309 = vector.extract_strided_slice %308 {offsets = [0, 0], sizes = [2, 32], strides = [1, 1]} : vector<4x32xf32> to vector<2x32xf32>
    %c0_113 = arith.constant 0 : index
    %c128_114 = arith.constant 128 : index
    %310 = vector.load %arg15[%c0_113, %c128_114] : memref<2x256xf32, #tpu.memory_space<vmem>>, vector<2x32xf32>
    tpu.vector_store %arg15[%c0_113, %c128_114], %309 {strides = array<i32>} : memref<2x256xf32, #tpu.memory_space<vmem>>, vector<2x32xf32>,
    %311 = vector.extract_strided_slice %308 {offsets = [2, 0], sizes = [2, 32], strides = [1, 1]} : vector<4x32xf32> to vector<2x32xf32>
    %c0_115 = arith.constant 0 : index
    %c96_116 = arith.constant 96 : index
    %312 = vector.load %arg16[%c0_115, %c96_116] : memref<2x256xf32, #tpu.memory_space<vmem>>, vector<2x32xf32>
    tpu.vector_store %arg16[%c0_115, %c96_116], %311 {strides = array<i32>} : memref<2x256xf32, #tpu.memory_space<vmem>>, vector<2x32xf32>,
    %313 = arith.truncf %301 : vector<4x32xf32> to vector<4x32xbf16>
    %c0_117 = arith.constant 0 : index
    %c5_118 = arith.constant 5 : index
    %c0_119 = arith.constant 0 : index
    %314 = vector.load %arg13[%c0_117, %c5_118, %c0_119] : memref<2x8x128xf32, #tpu.memory_space<vmem>>, vector<2x1x128xf32>
    %315 = vector.shape_cast %314 : vector<2x1x128xf32> to vector<2x128xf32>
    %316 = vector.extract_strided_slice %313 {offsets = [0, 0], sizes = [2, 32], strides = [1, 1]} : vector<4x32xbf16> to vector<2x32xbf16>
    %cst_120 = arith.constant dense<0.000000e+00> : vector<2x128xf32>
    %317 = tpu.matmul %316, %48, %cst_120 {dimension_numbers = #tpu.dot_dimension_numbers<[1], [0], [0], [1], [0, 0, 1, 1], [], []>} : vector<2x32xbf16>, vector<32x128xbf16>, vector<2x128xf32> -> vector<2x128xf32>
    %318 = arith.addf %315, %317 : vector<2x128xf32>
    %c0_121 = arith.constant 0 : index
    %c2_122 = arith.constant 2 : index
    %c0_123 = arith.constant 0 : index
    %319 = vector.load %arg14[%c0_121, %c2_122, %c0_123] : memref<2x8x128xf32, #tpu.memory_space<vmem>>, vector<2x1x128xf32>
    %320 = vector.shape_cast %319 : vector<2x1x128xf32> to vector<2x128xf32>
    %321 = vector.extract_strided_slice %313 {offsets = [2, 0], sizes = [2, 32], strides = [1, 1]} : vector<4x32xbf16> to vector<2x32xbf16>
    %cst_124 = arith.constant dense<0.000000e+00> : vector<2x128xf32>
    %322 = tpu.matmul %321, %50, %cst_124 {dimension_numbers = #tpu.dot_dimension_numbers<[1], [0], [0], [1], [0, 0, 1, 1], [], []>} : vector<2x32xbf16>, vector<32x128xbf16>, vector<2x128xf32> -> vector<2x128xf32>
    %323 = arith.addf %320, %322 : vector<2x128xf32>
    %324 = tpu.concatenate %318, %323 in 0 : vector<2x128xf32>, vector<2x128xf32> -> vector<4x128xf32>
    %325 = arith.negf %324 : vector<4x128xf32>
    %326 = math.exp %325 : vector<4x128xf32>
    %cst_125 = arith.constant 1.000000e+00 : f32
    %327 = vector.broadcast %cst_125 : f32 to vector<4x128xf32>
    %328 = arith.addf %327, %326 : vector<4x128xf32>
    %329 = arith.divf %327, %328 : vector<4x128xf32>
    %330 = arith.mulf %329, %64 : vector<4x128xf32>
    %331 = arith.addf %330, %67 : vector<4x128xf32>
    %332 = vector.extract_strided_slice %331 {offsets = [0, 0], sizes = [4, 32], strides = [1, 1]} : vector<4x128xf32> to vector<4x32xf32>
    %333 = vector.extract_strided_slice %331 {offsets = [0, 32], sizes = [4, 32], strides = [1, 1]} : vector<4x128xf32> to vector<4x32xf32>
    %334 = vector.extract_strided_slice %331 {offsets = [0, 64], sizes = [4, 32], strides = [1, 1]} : vector<4x128xf32> to vector<4x32xf32>
    %335 = vector.extract_strided_slice %331 {offsets = [0, 96], sizes = [4, 32], strides = [1, 1]} : vector<4x128xf32> to vector<4x32xf32>
    %336 = arith.mulf %333, %304 : vector<4x32xf32>
    %337 = arith.mulf %332, %334 : vector<4x32xf32>
    %338 = arith.addf %336, %337 : vector<4x32xf32>
    %339 = math.tanh %338 : vector<4x32xf32>
    %340 = arith.mulf %335, %339 : vector<4x32xf32>
    %c5_i32_126 = arith.constant 5 : i32
    %341 = arith.addi %68, %c5_i32_126 : i32
    %c2_i32_127 = arith.constant 2 : i32
    %342 = arith.addi %70, %c2_i32_127 : i32
    %343 = vector.broadcast %341 : i32 to vector<4x1xi32>
    %344 = vector.broadcast %342 : i32 to vector<4x1xi32>
    %345 = arith.select %55, %343, %344 : vector<4x1xi1>, vector<4x1xi32>
    %346 = arith.cmpi slt, %345, %52 : vector<4x1xi32>
    %347 = vector.shape_cast %346 : vector<4x1xi1> to vector<4x1xi1>
    %348 = vector.broadcast %347 : vector<4x1xi1> to vector<4x32xi1>
    %349 = arith.select %348, %340, %301 : vector<4x32xi1>, vector<4x32xf32>
    %350 = vector.shape_cast %346 : vector<4x1xi1> to vector<4x1xi1>
    %351 = vector.broadcast %350 : vector<4x1xi1> to vector<4x32xi1>
    %352 = arith.select %351, %338, %304 : vector<4x32xi1>, vector<4x32xf32>
    %cst_128 = arith.constant 0.000000e+00 : f32
    %353 = vector.shape_cast %346 : vector<4x1xi1> to vector<4x1xi1>
    %354 = vector.broadcast %353 : vector<4x1xi1> to vector<4x32xi1>
    %355 = vector.broadcast %cst_128 : f32 to vector<4x32xf32>
    %356 = arith.select %354, %340, %355 : vector<4x32xi1>, vector<4x32xf32>
    %357 = vector.extract_strided_slice %356 {offsets = [0, 0], sizes = [2, 32], strides = [1, 1]} : vector<4x32xf32> to vector<2x32xf32>
    %c0_129 = arith.constant 0 : index
    %c160_130 = arith.constant 160 : index
    %358 = vector.load %arg15[%c0_129, %c160_130] : memref<2x256xf32, #tpu.memory_space<vmem>>, vector<2x32xf32>
    tpu.vector_store %arg15[%c0_129, %c160_130], %357 {strides = array<i32>} : memref<2x256xf32, #tpu.memory_space<vmem>>, vector<2x32xf32>,
    %359 = vector.extract_strided_slice %356 {offsets = [2, 0], sizes = [2, 32], strides = [1, 1]} : vector<4x32xf32> to vector<2x32xf32>
    %c0_131 = arith.constant 0 : index
    %c64_132 = arith.constant 64 : index
    %360 = vector.load %arg16[%c0_131, %c64_132] : memref<2x256xf32, #tpu.memory_space<vmem>>, vector<2x32xf32>
    tpu.vector_store %arg16[%c0_131, %c64_132], %359 {strides = array<i32>} : memref<2x256xf32, #tpu.memory_space<vmem>>, vector<2x32xf32>,
    %361 = arith.truncf %349 : vector<4x32xf32> to vector<4x32xbf16>
    %c0_133 = arith.constant 0 : index
    %c6_134 = arith.constant 6 : index
    %c0_135 = arith.constant 0 : index
    %362 = vector.load %arg13[%c0_133, %c6_134, %c0_135] : memref<2x8x128xf32, #tpu.memory_space<vmem>>, vector<2x1x128xf32>
    %363 = vector.shape_cast %362 : vector<2x1x128xf32> to vector<2x128xf32>
    %364 = vector.extract_strided_slice %361 {offsets = [0, 0], sizes = [2, 32], strides = [1, 1]} : vector<4x32xbf16> to vector<2x32xbf16>
    %cst_136 = arith.constant dense<0.000000e+00> : vector<2x128xf32>
    %365 = tpu.matmul %364, %48, %cst_136 {dimension_numbers = #tpu.dot_dimension_numbers<[1], [0], [0], [1], [0, 0, 1, 1], [], []>} : vector<2x32xbf16>, vector<32x128xbf16>, vector<2x128xf32> -> vector<2x128xf32>
    %366 = arith.addf %363, %365 : vector<2x128xf32>
    %c0_137 = arith.constant 0 : index
    %c1_138 = arith.constant 1 : index
    %c0_139 = arith.constant 0 : index
    %367 = vector.load %arg14[%c0_137, %c1_138, %c0_139] : memref<2x8x128xf32, #tpu.memory_space<vmem>>, vector<2x1x128xf32>
    %368 = vector.shape_cast %367 : vector<2x1x128xf32> to vector<2x128xf32>
    %369 = vector.extract_strided_slice %361 {offsets = [2, 0], sizes = [2, 32], strides = [1, 1]} : vector<4x32xbf16> to vector<2x32xbf16>
    %cst_140 = arith.constant dense<0.000000e+00> : vector<2x128xf32>
    %370 = tpu.matmul %369, %50, %cst_140 {dimension_numbers = #tpu.dot_dimension_numbers<[1], [0], [0], [1], [0, 0, 1, 1], [], []>} : vector<2x32xbf16>, vector<32x128xbf16>, vector<2x128xf32> -> vector<2x128xf32>
    %371 = arith.addf %368, %370 : vector<2x128xf32>
    %372 = tpu.concatenate %366, %371 in 0 : vector<2x128xf32>, vector<2x128xf32> -> vector<4x128xf32>
    %373 = arith.negf %372 : vector<4x128xf32>
    %374 = math.exp %373 : vector<4x128xf32>
    %cst_141 = arith.constant 1.000000e+00 : f32
    %375 = vector.broadcast %cst_141 : f32 to vector<4x128xf32>
    %376 = arith.addf %375, %374 : vector<4x128xf32>
    %377 = arith.divf %375, %376 : vector<4x128xf32>
    %378 = arith.mulf %377, %64 : vector<4x128xf32>
    %379 = arith.addf %378, %67 : vector<4x128xf32>
    %380 = vector.extract_strided_slice %379 {offsets = [0, 0], sizes = [4, 32], strides = [1, 1]} : vector<4x128xf32> to vector<4x32xf32>
    %381 = vector.extract_strided_slice %379 {offsets = [0, 32], sizes = [4, 32], strides = [1, 1]} : vector<4x128xf32> to vector<4x32xf32>
    %382 = vector.extract_strided_slice %379 {offsets = [0, 64], sizes = [4, 32], strides = [1, 1]} : vector<4x128xf32> to vector<4x32xf32>
    %383 = vector.extract_strided_slice %379 {offsets = [0, 96], sizes = [4, 32], strides = [1, 1]} : vector<4x128xf32> to vector<4x32xf32>
    %384 = arith.mulf %381, %352 : vector<4x32xf32>
    %385 = arith.mulf %380, %382 : vector<4x32xf32>
    %386 = arith.addf %384, %385 : vector<4x32xf32>
    %387 = math.tanh %386 : vector<4x32xf32>
    %388 = arith.mulf %383, %387 : vector<4x32xf32>
    %c6_i32_142 = arith.constant 6 : i32
    %389 = arith.addi %68, %c6_i32_142 : i32
    %c1_i32_143 = arith.constant 1 : i32
    %390 = arith.addi %70, %c1_i32_143 : i32
    %391 = vector.broadcast %389 : i32 to vector<4x1xi32>
    %392 = vector.broadcast %390 : i32 to vector<4x1xi32>
    %393 = arith.select %55, %391, %392 : vector<4x1xi1>, vector<4x1xi32>
    %394 = arith.cmpi slt, %393, %52 : vector<4x1xi32>
    %395 = vector.shape_cast %394 : vector<4x1xi1> to vector<4x1xi1>
    %396 = vector.broadcast %395 : vector<4x1xi1> to vector<4x32xi1>
    %397 = arith.select %396, %388, %349 : vector<4x32xi1>, vector<4x32xf32>
    %398 = vector.shape_cast %394 : vector<4x1xi1> to vector<4x1xi1>
    %399 = vector.broadcast %398 : vector<4x1xi1> to vector<4x32xi1>
    %400 = arith.select %399, %386, %352 : vector<4x32xi1>, vector<4x32xf32>
    %cst_144 = arith.constant 0.000000e+00 : f32
    %401 = vector.shape_cast %394 : vector<4x1xi1> to vector<4x1xi1>
    %402 = vector.broadcast %401 : vector<4x1xi1> to vector<4x32xi1>
    %403 = vector.broadcast %cst_144 : f32 to vector<4x32xf32>
    %404 = arith.select %402, %388, %403 : vector<4x32xi1>, vector<4x32xf32>
    %405 = vector.extract_strided_slice %404 {offsets = [0, 0], sizes = [2, 32], strides = [1, 1]} : vector<4x32xf32> to vector<2x32xf32>
    %c0_145 = arith.constant 0 : index
    %c192_146 = arith.constant 192 : index
    %406 = vector.load %arg15[%c0_145, %c192_146] : memref<2x256xf32, #tpu.memory_space<vmem>>, vector<2x32xf32>
    tpu.vector_store %arg15[%c0_145, %c192_146], %405 {strides = array<i32>} : memref<2x256xf32, #tpu.memory_space<vmem>>, vector<2x32xf32>,
    %407 = vector.extract_strided_slice %404 {offsets = [2, 0], sizes = [2, 32], strides = [1, 1]} : vector<4x32xf32> to vector<2x32xf32>
    %c0_147 = arith.constant 0 : index
    %c32_148 = arith.constant 32 : index
    %408 = vector.load %arg16[%c0_147, %c32_148] : memref<2x256xf32, #tpu.memory_space<vmem>>, vector<2x32xf32>
    tpu.vector_store %arg16[%c0_147, %c32_148], %407 {strides = array<i32>} : memref<2x256xf32, #tpu.memory_space<vmem>>, vector<2x32xf32>,
    %409 = arith.truncf %397 : vector<4x32xf32> to vector<4x32xbf16>
    %c0_149 = arith.constant 0 : index
    %c7_150 = arith.constant 7 : index
    %c0_151 = arith.constant 0 : index
    %410 = vector.load %arg13[%c0_149, %c7_150, %c0_151] : memref<2x8x128xf32, #tpu.memory_space<vmem>>, vector<2x1x128xf32>
    %411 = vector.shape_cast %410 : vector<2x1x128xf32> to vector<2x128xf32>
    %412 = vector.extract_strided_slice %409 {offsets = [0, 0], sizes = [2, 32], strides = [1, 1]} : vector<4x32xbf16> to vector<2x32xbf16>
    %cst_152 = arith.constant dense<0.000000e+00> : vector<2x128xf32>
    %413 = tpu.matmul %412, %48, %cst_152 {dimension_numbers = #tpu.dot_dimension_numbers<[1], [0], [0], [1], [0, 0, 1, 1], [], []>} : vector<2x32xbf16>, vector<32x128xbf16>, vector<2x128xf32> -> vector<2x128xf32>
    %414 = arith.addf %411, %413 : vector<2x128xf32>
    %c0_153 = arith.constant 0 : index
    %c0_154 = arith.constant 0 : index
    %c0_155 = arith.constant 0 : index
    %415 = vector.load %arg14[%c0_153, %c0_154, %c0_155] : memref<2x8x128xf32, #tpu.memory_space<vmem>>, vector<2x1x128xf32>
    %416 = vector.shape_cast %415 : vector<2x1x128xf32> to vector<2x128xf32>
    %417 = vector.extract_strided_slice %409 {offsets = [2, 0], sizes = [2, 32], strides = [1, 1]} : vector<4x32xbf16> to vector<2x32xbf16>
    %cst_156 = arith.constant dense<0.000000e+00> : vector<2x128xf32>
    %418 = tpu.matmul %417, %50, %cst_156 {dimension_numbers = #tpu.dot_dimension_numbers<[1], [0], [0], [1], [0, 0, 1, 1], [], []>} : vector<2x32xbf16>, vector<32x128xbf16>, vector<2x128xf32> -> vector<2x128xf32>
    %419 = arith.addf %416, %418 : vector<2x128xf32>
    %420 = tpu.concatenate %414, %419 in 0 : vector<2x128xf32>, vector<2x128xf32> -> vector<4x128xf32>
    %421 = arith.negf %420 : vector<4x128xf32>
    %422 = math.exp %421 : vector<4x128xf32>
    %cst_157 = arith.constant 1.000000e+00 : f32
    %423 = vector.broadcast %cst_157 : f32 to vector<4x128xf32>
    %424 = arith.addf %423, %422 : vector<4x128xf32>
    %425 = arith.divf %423, %424 : vector<4x128xf32>
    %426 = arith.mulf %425, %64 : vector<4x128xf32>
    %427 = arith.addf %426, %67 : vector<4x128xf32>
    %428 = vector.extract_strided_slice %427 {offsets = [0, 0], sizes = [4, 32], strides = [1, 1]} : vector<4x128xf32> to vector<4x32xf32>
    %429 = vector.extract_strided_slice %427 {offsets = [0, 32], sizes = [4, 32], strides = [1, 1]} : vector<4x128xf32> to vector<4x32xf32>
    %430 = vector.extract_strided_slice %427 {offsets = [0, 64], sizes = [4, 32], strides = [1, 1]} : vector<4x128xf32> to vector<4x32xf32>
    %431 = vector.extract_strided_slice %427 {offsets = [0, 96], sizes = [4, 32], strides = [1, 1]} : vector<4x128xf32> to vector<4x32xf32>
    %432 = arith.mulf %429, %400 : vector<4x32xf32>
    %433 = arith.mulf %428, %430 : vector<4x32xf32>
    %434 = arith.addf %432, %433 : vector<4x32xf32>
    %435 = math.tanh %434 : vector<4x32xf32>
    %436 = arith.mulf %431, %435 : vector<4x32xf32>
    %c7_i32_158 = arith.constant 7 : i32
    %437 = arith.addi %68, %c7_i32_158 : i32
    %c0_i32_159 = arith.constant 0 : i32
    %438 = arith.addi %70, %c0_i32_159 : i32
    %439 = vector.broadcast %437 : i32 to vector<4x1xi32>
    %440 = vector.broadcast %438 : i32 to vector<4x1xi32>
    %441 = arith.select %55, %439, %440 : vector<4x1xi1>, vector<4x1xi32>
    %442 = arith.cmpi slt, %441, %52 : vector<4x1xi32>
    %443 = vector.shape_cast %442 : vector<4x1xi1> to vector<4x1xi1>
    %444 = vector.broadcast %443 : vector<4x1xi1> to vector<4x32xi1>
    %445 = arith.select %444, %436, %397 : vector<4x32xi1>, vector<4x32xf32>
    %446 = vector.shape_cast %442 : vector<4x1xi1> to vector<4x1xi1>
    %447 = vector.broadcast %446 : vector<4x1xi1> to vector<4x32xi1>
    %448 = arith.select %447, %434, %400 : vector<4x32xi1>, vector<4x32xf32>
    %cst_160 = arith.constant 0.000000e+00 : f32
    %449 = vector.shape_cast %442 : vector<4x1xi1> to vector<4x1xi1>
    %450 = vector.broadcast %449 : vector<4x1xi1> to vector<4x32xi1>
    %451 = vector.broadcast %cst_160 : f32 to vector<4x32xf32>
    %452 = arith.select %450, %436, %451 : vector<4x32xi1>, vector<4x32xf32>
    %453 = vector.extract_strided_slice %452 {offsets = [0, 0], sizes = [2, 32], strides = [1, 1]} : vector<4x32xf32> to vector<2x32xf32>
    %c0_161 = arith.constant 0 : index
    %c224_162 = arith.constant 224 : index
    %454 = vector.load %arg15[%c0_161, %c224_162] : memref<2x256xf32, #tpu.memory_space<vmem>>, vector<2x32xf32>
    tpu.vector_store %arg15[%c0_161, %c224_162], %453 {strides = array<i32>} : memref<2x256xf32, #tpu.memory_space<vmem>>, vector<2x32xf32>,
    %455 = vector.extract_strided_slice %452 {offsets = [2, 0], sizes = [2, 32], strides = [1, 1]} : vector<4x32xf32> to vector<2x32xf32>
    %c0_163 = arith.constant 0 : index
    %c0_164 = arith.constant 0 : index
    %456 = vector.load %arg16[%c0_163, %c0_164] : memref<2x256xf32, #tpu.memory_space<vmem>>, vector<2x32xf32>
    tpu.vector_store %arg16[%c0_163, %c0_164], %455 {strides = array<i32>} : memref<2x256xf32, #tpu.memory_space<vmem>>, vector<2x32xf32>,
    %c0_165 = arith.constant 0 : index
    %c0_166 = arith.constant 0 : index
    %457 = vector.load %arg11[%c0_165, %c0_166] : memref<4x32xf32, #tpu.memory_space<vmem>>, vector<4x32xf32>
    tpu.vector_store %arg11[%c0_165, %c0_166], %445 {strides = array<i32>} : memref<4x32xf32, #tpu.memory_space<vmem>>, vector<4x32xf32>,
    %c0_167 = arith.constant 0 : index
    %c0_168 = arith.constant 0 : index
    %458 = vector.load %arg12[%c0_167, %c0_168] : memref<4x32xf32, #tpu.memory_space<vmem>>, vector<4x32xf32>
    tpu.vector_store %arg12[%c0_167, %c0_168], %448 {strides = array<i32>} : memref<4x32xf32, #tpu.memory_space<vmem>>, vector<4x32xf32>,
    %c0_169 = arith.constant 0 : index
    %c0_170 = arith.constant 0 : index
    %459 = vector.load %arg15[%c0_169, %c0_170] : memref<2x256xf32, #tpu.memory_space<vmem>>, vector<2x256xf32>
    %c0_171 = arith.constant 0 : index
    %c0_172 = arith.constant 0 : index
    %c0_173 = arith.constant 0 : index
    %460 = vector.load %arg7[%c0_171, %c0_172, %c0_173] : memref<1x2x256xf32, #tpu.memory_space<vmem>>, vector<1x2x256xf32>
    %461 = vector.shape_cast %460 : vector<1x2x256xf32> to vector<2x256xf32>
    %462 = vector.shape_cast %459 : vector<2x256xf32> to vector<1x2x256xf32>
    tpu.vector_store %arg7[%c0_171, %c0_172, %c0_173], %462 {strides = array<i32>} : memref<1x2x256xf32, #tpu.memory_space<vmem>>, vector<1x2x256xf32>,
    %c0_174 = arith.constant 0 : index
    %c0_175 = arith.constant 0 : index
    %463 = vector.load %arg16[%c0_174, %c0_175] : memref<2x256xf32, #tpu.memory_space<vmem>>, vector<2x256xf32>
    %c0_176 = arith.constant 0 : index
    %c0_177 = arith.constant 0 : index
    %c0_178 = arith.constant 0 : index
    %464 = vector.load %arg8[%c0_176, %c0_177, %c0_178] : memref<1x2x256xf32, #tpu.memory_space<vmem>>, vector<1x2x256xf32>
    %465 = vector.shape_cast %464 : vector<1x2x256xf32> to vector<2x256xf32>
    %466 = vector.shape_cast %463 : vector<2x256xf32> to vector<1x2x256xf32>
    tpu.vector_store %arg8[%c0_176, %c0_177, %c0_178], %466 {strides = array<i32>} : memref<1x2x256xf32, #tpu.memory_space<vmem>>, vector<1x2x256xf32>,
    %c2_i32_179 = arith.constant 2 : i32
    %467 = arith.cmpi eq, %arg0, %c2_i32_179 : i32
    %468 = arith.extui %467 : i1 to i32
    %c0_i32_180 = arith.constant 0 : i32
    %469 = arith.cmpi ne, %468, %c0_i32_180 : i32
    scf.if %469 {
      %c0_181 = arith.constant 0 : index
      %c0_182 = arith.constant 0 : index
      %470 = vector.load %arg9[%c0_181, %c0_182] : memref<4x32xf32, #tpu.memory_space<vmem>>, vector<4x32xf32>
      tpu.vector_store %arg9[%c0_181, %c0_182], %445 {strides = array<i32>} : memref<4x32xf32, #tpu.memory_space<vmem>>, vector<4x32xf32>,
      %c0_183 = arith.constant 0 : index
      %c0_184 = arith.constant 0 : index
      %471 = vector.load %arg10[%c0_183, %c0_184] : memref<4x32xf32, #tpu.memory_space<vmem>>, vector<4x32xf32>
      tpu.vector_store %arg10[%c0_183, %c0_184], %448 {strides = array<i32>} : memref<4x32xf32, #tpu.memory_space<vmem>>, vector<4x32xf32>,
    } else {
    }
    return
  }
  func.func @transform_0(%arg0: i32) -> (i32, i32) {
    %c0_i32 = arith.constant 0 : i32
    %c0_i32_0 = arith.constant 0 : i32
    %c0_i32_1 = arith.constant 0 : i32
    return %c0_i32, %c0_i32_0 : i32, i32
  }
  func.func @transform_1(%arg0: i32) -> (i32, i32, i32) {
    %c0_i32 = arith.constant 0 : i32
    %c0_i32_0 = arith.constant 0 : i32
    %c0_i32_1 = arith.constant 0 : i32
    return %c0_i32, %arg0, %c0_i32_0 : i32, i32, i32
  }
  func.func @transform_2(%arg0: i32) -> (i32, i32, i32) {
    %c2_i32 = arith.constant 2 : i32
    %0 = arith.subi %c2_i32, %arg0 : i32
    %c0_i32 = arith.constant 0 : i32
    %c0_i32_0 = arith.constant 0 : i32
    %c0_i32_1 = arith.constant 0 : i32
    return %c0_i32, %0, %c0_i32_0 : i32, i32, i32
  }
  func.func @transform_3(%arg0: i32) -> (i32, i32, i32) {
    %c0_i32 = arith.constant 0 : i32
    %c0_i32_0 = arith.constant 0 : i32
    %c0_i32_1 = arith.constant 0 : i32
    %c0_i32_2 = arith.constant 0 : i32
    return %c0_i32, %c0_i32_0, %c0_i32_1 : i32, i32, i32
  }
  func.func @transform_4(%arg0: i32) -> (i32, i32, i32) {
    %c0_i32 = arith.constant 0 : i32
    %c0_i32_0 = arith.constant 0 : i32
    %c0_i32_1 = arith.constant 0 : i32
    %c0_i32_2 = arith.constant 0 : i32
    return %c0_i32, %c0_i32_0, %c0_i32_1 : i32, i32, i32
  }
  func.func @transform_5(%arg0: i32) -> (i32, i32, i32) {
    %c0_i32 = arith.constant 0 : i32
    %c0_i32_0 = arith.constant 0 : i32
    %c0_i32_1 = arith.constant 0 : i32
    %c0_i32_2 = arith.constant 0 : i32
    return %c0_i32, %c0_i32_0, %c0_i32_1 : i32, i32, i32
  }
  func.func @transform_6(%arg0: i32) -> (i32, i32, i32) {
    %c0_i32 = arith.constant 0 : i32
    %c0_i32_0 = arith.constant 0 : i32
    %c0_i32_1 = arith.constant 0 : i32
    return %arg0, %c0_i32, %c0_i32_0 : i32, i32, i32
  }
  func.func @transform_7(%arg0: i32) -> (i32, i32, i32) {
    %c2_i32 = arith.constant 2 : i32
    %0 = arith.subi %c2_i32, %arg0 : i32
    %c0_i32 = arith.constant 0 : i32
    %c0_i32_0 = arith.constant 0 : i32
    %c0_i32_1 = arith.constant 0 : i32
    return %0, %c0_i32, %c0_i32_0 : i32, i32, i32
  }
  func.func @transform_8(%arg0: i32) -> (i32, i32) {
    %c0_i32 = arith.constant 0 : i32
    %c0_i32_0 = arith.constant 0 : i32
    %c0_i32_1 = arith.constant 0 : i32
    return %c0_i32, %c0_i32_0 : i32, i32
  }
  func.func @transform_9(%arg0: i32) -> (i32, i32) {
    %c0_i32 = arith.constant 0 : i32
    %c0_i32_0 = arith.constant 0 : i32
    %c0_i32_1 = arith.constant 0 : i32
    return %c0_i32, %c0_i32_0 : i32, i32
  }
}

</mosaic_0001>

<bundles_post_ra>
// kernel: tpu_custom_call.1
= control target key start
LH: loop header
LB: loop body
LE: loop exit
PB: predicated region body
PF: predicated region fallthrough
CT: control target
= control target key end

     0   :  { %s3857_s0 = inlined_call_operand.vmem [shape: s32[2,1], index: 0, kind: input, shape index: {}]   ;;  %s3858_s1 = inlined_call_operand.vmem [shape: f32[2,24,16], index: 1, kind: input, shape index: {}]   ;;  %s3859_s2 = inlined_call_operand.vmem [shape: f32[2,24,16], index: 2, kind: input, shape index: {}]   ;;  %s3860_s3 = inlined_call_operand.vmem [shape: bf16[2,16,128], index: 3, kind: input, shape index: {}]   ;;  %s3861_s4 = inlined_call_operand.vmem [shape: bf16[2,32,128], index: 4, kind: input, shape index: {}]   ;;  %s3862_s5 = inlined_call_operand.vmem [shape: f32[2,1,128], index: 5, kind: input, shape index: {}]   ;;  %s3863_s6 = inlined_call_operand.hbm [shape: f32[3,2,256], index: 6, kind: output, shape index: {0}]   ;;  %s3864_s7 = inlined_call_operand.hbm [shape: f32[3,2,256], index: 7, kind: output, shape index: {1}]   ;;  %s3865_s8 = inlined_call_operand.hbm [shape: f32[4,32], index: 8, kind: output, shape index: {2}]   ;;  %s3866_s9 = inlined_call_operand.hbm [shape: f32[4,32], index: 9, kind: output, shape index: {3}]  }
   0x1   :  { %3877 = sst [smem:[#allocation27_spill]] %s3857_s0 }
   0x2   :  { %3878 = sst [smem:[#allocation28_spill]] %s3858_s1 }
   0x3   :  { %15 = vsyncpa [#allocation11], 0 }
   0x4   :  { %17 = vsyncpa [#allocation11 + $0x1], 0 }
   0x5   :  { %18 = vsyncpa [#allocation13], 0 }
   0x6   :  { %20 = vsyncpa [#allocation13 + $0x1], 0 }
   0x7   :  { %21 = vsyncpa [#allocation16], 0  ;;  %s3027_s30 = smov 0   ;;  %s3029_s10 = smov 0  }
   0x8   :  { %s3031_s11 = smov 0   ;;  %s3033_s12 = smov 0  }
   0x9   :  { %s3035_s13 = smov 0   ;;  %s3037_s14 = smov 0  }
   0xa   :  { %s3039_s15 = smov 0  }
   0xb LB: > { %3879 = sst [smem:[#allocation21_spill]] %s2958_s14  ;;  %s3063_s16 = sadd.s32 4294967295, %s2962_s15   ;;  %s2962_s15 = sphi %s3039_s15, %s3901_s15   ;;  %s2958_s14 = sphi %s3037_s14, %s3904_s14   ;;  %s2954_s13 = sphi %s3035_s13, %s3909_s13   ;;  %s2950_s12 = sphi %s3033_s12, %s3908_s12   ;;  %s2946_s11 = sphi %s3031_s11, %s3907_s11   ;;  %s2942_s10 = sphi %s3029_s10, %s3906_s10   ;;  %s2938_s30 = sphi %s3027_s30, %s3905_s30  }
   0xc   : > { %s3867_s17 = sadd.s32 4294967294, %s2962_s15   ;;  %s3067_s18 = sadd.s32 1, %s2962_s15  }
   0xd   : > { %3880 = sst [smem:[#allocation22_spill]] %s3067_s18  ;;  %s55_s19 = sadd.s32 1, %s2958_s14 }
   0xe   : > { %s52_s20 = ssub.s32 %s2962_s15, %s3067_s18  ;;  %p62_p0 = scmp.ne.s32.totalorder %s2958_s14, %s2954_s13 }
   0xf   : > { %p53_p1 = scmp.eq.s32.totalorder %s52_s20, 0  ;;  %p63_p2 = scmp.eq.s32.totalorder %s2962_s15, 0 }
  0x10   : > { %s3868_s21 = ssub.s32 2, %s2962_s15  ;;  %s79_s22 = ssub.s32 2, %s3067_s18 }
  0x11   : > { %s3078_s23 = scalar_select %p53_p1, %s2958_s14, %s55_s19  }
  0x12   : > { %p3083_p3 = por %p63_p2, %p62_p0  ;;  %s80_s25 = ssub.s32 %s3868_s21, %s79_s22 }
  0x13   : > { %3881 = sst [smem:[#allocation23_spill]] %s3078_s23  ;;  %p81_p4 = scmp.eq.s32.totalorder %s80_s25, 0 }
  0x14   : > { %s83_s26 = sadd.s32 1, %s2950_s12  ;;  %p90_p5 = scmp.ne.s32.totalorder %s2950_s12, %s2946_s11 }
  0x15   : > { %p183_p6 = scmp.eq.s32.totalorder %s3063_s16, 2  ;;  %p188_p9 = scmp.ne.s32.totalorder %s2954_s13, %s2942_s10 }
  0x16   : > { %s3094_s27 = scalar_select %p81_p4, %s2950_s12, %s83_s26  }
  0x17   : > { %p3096_p7 = por %p90_p5, %p63_p2  ;;  %p3105_p8 = por %p183_p6, %p62_p0 }
  0x18   : > { %3883 = sst [smem:[#allocation24_spill]] %s3094_s27  ;;  %p189_p10 = scmp.eq.s32.totalorder %s3867_s17, 2 }
  0x19   : > { %p3115_p11 = por %p183_p6, %p90_p5  ;;  %p216_p12 = scmp.ne.s32.totalorder %s2946_s11, %s2938_s30 }
  0x1a   : > { %p3121_p13 = por %p189_p10, %p188_p9  ;;  %p2352_p0 = scmp.ge.s32.totalorder %s2962_s15, 3 }
  0x1b   : > { %p3125_p1 = por %p216_p12, %p189_p10 }
  0x1c   : > { %s3887_s20 = scalar_select %p3121_p13, 1, 0 }
  0x1d   : > { %s3889_s22 = scalar_select %p3125_p1, 1, 0 }
  0x1e   : > { %3888 = sst [smem:[#allocation25_spill]] %s3887_s20  ;;  %287 = sbr.rel (%p2352_p0) target bundleno = 55 (0x37), region = 32 }
  0x1f   : > { %3890 = sst [smem:[#allocation26_spill]] %s3889_s22 }
  0x25   : > { %290 = sbr.rel (!%p3083_p3) target bundleno = 48 (0x30), region = 36  ;;  %s292_s25 = sand.u32 (%p3083_p3), 1, %s2958_s14  }
  0x26   : > { %s2354_s26 = sshll.u32 (%p3083_p3), %s2962_s15, 3  ;;  %s2353_s17 = sshll.u32 (%p3083_p3), %s292_s25, 4 }
  0x27   : > { %s3891_s1 = sld [smem:[#allocation28_spill]] (%p3083_p3)  ;;  %s294_s27 = scalar_lea.vmem (%p3083_p3), [#allocation8], %s2353_s17 }
  0x2d   : > { %s296_s23 = scalar_lea.vmem %s3891_s1, %s2354_s26 }
  0x2e   : > { %v326_v0 = vld [vmem:[%s296_s23] sm:$0xff]  ;;  %v328_v1 = vld [vmem:[%s296_s23 + $0x18] sm:$0xff] }
  0x2f   : > { %327 = vst [vmem:[%s294_s27] sm:$0xff] %v326_v0  ;;  %329 = vst [vmem:[%s294_s27 + $0x8] sm:$0xff] %v328_v1 }
  0x30 PF: > { %335 = sbr.rel (!%p3096_p7) target bundleno = 55 (0x37), region = 74  ;;  %s337_s24 = sand.u32 (%p3096_p7), 1, %s2950_s12  }
  0x31   : > { %s3892_s18 = ssub.s32 (%p3096_p7), 2, %s2962_s15  ;;  %s2355_s22 = sshll.u32 (%p3096_p7), %s337_s24, 4 }
  0x32   : > { %s2356_s14 = sshll.u32 (%p3096_p7), %s3892_s18, 3  ;;  %s339_s23 = scalar_lea.vmem (%p3096_p7), [#allocation9], %s2355_s22 }
  0x33   : > { %s342_s21 = scalar_lea.vmem (%p3096_p7), %s3859_s2, %s2356_s14 }
  0x34   : > { %v372_v2 = vld [vmem:[%s342_s21] sm:$0xff] (%p3096_p7)  ;;  %v374_v3 = vld [vmem:[%s342_s21 + $0x18] sm:$0xff] (%p3096_p7) }
  0x35   : > { %373 = vst [vmem:[%s339_s23] sm:$0xff] (%p3096_p7), %v372_v2  ;;  %375 = vst [vmem:[%s339_s23 + $0x8] sm:$0xff] (%p3096_p7), %v374_v3 }
  0x37 PF: > { %p2357_p2 = scmp.ge.s32.totalorder %s2962_s15, 1  ;;  %p380_p3 = scmp.lt.s32.totalorder %s2962_s15, 4 }
  0x39   : > { %p381_p4 = pnand %p2357_p2, %p380_p3 }
  0x3a   : > { %s3148_s17 = sand.u32 (!%p381_p4), 1, %s2954_s13   ;;  %s394_s14 = sand.u32 (!%p381_p4), 1, %s2946_s11  }
  0x3b   : > { %384 = sbr.rel (%p381_p4) target bundleno = 6058 (0x17aa), region = 112  ;;  %s2358_s18 = sshll.u32 (!%p381_p4), %s3148_s17, 4 }
  0x3c   : > { %s3152_s27 = sshll.u32 (!%p381_p4), %s394_s14, 4  ;;  %s2360_s28 = sshll.u32 (!%p381_p4), %s3148_s17, 2 }
  0x3d   : > { %s3155_s20 = sshll.u32 (!%p381_p4), %s394_s14, 2  ;;  %s3157_s22 = scalar_lea.vmem (!%p381_p4), [#allocation8], %s2358_s18 }
  0x3e   : > { %s396_s26 = scalar_lea.vmem (!%p381_p4), [#allocation9], %s3152_s27  ;;  %s3160_s30 = scalar_lea.vmem (!%p381_p4), [#allocation10], %s2360_s28 }
  0x3f   : > { %p2362_p5 = scmp.ne.s32.totalorder (!%p381_p4), %s3063_s16, 0 }
  0x42   : > { %444 = sbr.rel (%p2362_p5) target bundleno = 73 (0x49), region = 124  ;;  %vm445_vm0 = vcmask (!%p2362_p5), 257024   ;;  %v2964_v4 = vmov (!%p2362_p5), 0.0  }
  0x43   : > { %446 = vst.msk [vmem:[#allocation2] sm:$0xf] (!%p2362_p5), %vm445_vm0, %v2964_v4  ;;  %447 = vst.msk [vmem:[#allocation3] sm:$0xf] (!%p2362_p5), %vm445_vm0, %v2964_v4 }
  0x49 PF: > { %v2726_v5 = vld [vmem:[%s3860_s3] sm:$0xff]   ;;  %v2965_v6 = vmov 0.0   ;;  %v2727_v7 = vld [vmem:[%s3860_s3 + $0x8] sm:$0xff]   ;;  %vm2966_vm1 = vmmov 0   ;;  %vm470_vm2 = vcmask 130048   ;;  %v3200_v17 = vld [vmem:[%s3861_s4 + $0x10] sm:$0xff]  }
  0x4a   : > { %2481 = vmatprep.subr.bf16.mxu0 %v2965_v6  ;;  %2487 = vmatprep.subr.bf16.mxu1 %v2965_v6  ;;  %v456_v8 = vld [vmem:[%s3157_s22] sm:$0xff]  ;;  %v2372_v12 = vld [vmem:[%s3157_s22 + $0x8] sm:$0xff]  ;;  %vm712_vm3 = vcmask 261120   ;;  %vm830_vm4 = vcmask 1041409   ;;  %vm837_vm5 = vcmask 1043459   ;;  %vm680_vm6 = vcmask 1041408  }
  0x4b   : > { %2482 = vmatpush3.bf16.msra.mxu0 %v2726_v5  ;;  %2483 = vmatprep.mubr.msk.bf16.mxu0 %vm2966_vm1, %v2965_v6  ;;  %v515_v9 = vld [vmem:[%s396_s26] sm:$0xff]  ;;  %v457_v10 = vpack.c.bf16 %v456_v8, %v456_v8  ;;  %v2374_v13 = vld [vmem:[%s396_s26 + $0x8] sm:$0xff]  ;;  %v575_v14 = vpack.c.bf16 %v2372_v12, %v2372_v12  ;;  %v2968_v12 = vmov 1.0   ;;  %s2969_s25 = smov 64   ;;  %s2970_s27 = smov 32   ;;  %vm902_vm13 = vcmask 1042176  }
  0x4c   : > { %2488 = vmatpush3.bf16.msra.mxu1 %v2727_v7  ;;  %2489 = vmatprep.mubr.msk.bf16.mxu1 %vm2966_vm1, %v2965_v6  ;;  %v516_v11 = vpack.c.bf16 %v515_v9, %v515_v9  ;;  %v623_v15 = vpack.c.bf16 %v2374_v13, %v2374_v13  ;;  %v3195_v16 = vld [vmem:[%s3861_s4] sm:$0xff]   ;;  %v3202_v18 = vld [vmem:[#allocation2] sm:$0xf]  ;;  %v3210_v19 = vld [vmem:[%s3861_s4 + $0x8] sm:$0xff]   ;;  %s3874_s26 = ssub.s32 2, %s3063_s16  ;;  %s3893_s0 = sld [smem:[#allocation27_spill]] }
  0x4d   : > { %2493 = vmatprep.subr.bf16.mxu0 %v2965_v6  ;;  %2499 = vmatprep.subr.bf16.mxu1 %v2965_v6  ;;  %v697_v20 = vpack.c.bf16 %v3202_v18, %v3202_v18  ;;  %v3219_v21 = vld [vmem:[%s3861_s4 + $0x18] sm:$0xff]   ;;  %v2366_v23 = vld [vmem:[%s3862_s5] ss:$0 sm:$0xff]  ;;  %v2369_v24 = vld [vmem:[%s3862_s5 + $0x1] ss:$0 sm:$0xff]  ;;  %s3267_s21 = sshll.u32 %s3874_s26, 3 }
  0x4e   : > { %2484 = vmatmul.mubr.msk.bf16.vlgmr.msra.gmra.mrb[0].mxu0 %vm470_vm2, %v457_v10  ;;  %s3275_s18 = sshll.u32 %s3063_s16, 3  ;;  %s870_s28 = sadd.s32 7, %s3267_s21 }
  0x4f   : > { %2490 = vmatmul.mubr.msk.bf16.vlgmr.msra.gmra.mrb[0].mxu1 %vm470_vm2, %v516_v11  ;;  %2494 = vmatpush3.bf16.msra.mxu0 %v2726_v5  ;;  %v765_v22 = vrot.slane %v697_v20, 1  ;;  %v2967_v11 = vmov 0   ;;  %s3875_s22 = smov 96   ;;  %s1050_s23 = sadd.s32 1, %s3275_s18 }
  0x50   : > { %2500 = vmatpush3.bf16.msra.mxu1 %v2727_v7  ;;  %2495 = vmatprep.mubr.msk.bf16.mxu0 %vm2966_vm1, %v2965_v6  ;;  %v682_v7 = vlaneseq  ;;  %s1051_s14 = sadd.s32 6, %s3267_s21  ;;  %s1932_s24 = sadd.s32 6, %s3275_s18 }
  0x51   : > { %2501 = vmatprep.mubr.msk.bf16.mxu1 %vm2966_vm1, %v2965_v6  ;;  %2505 = vmatprep.subr.bf16.mxu0 %v2965_v6  ;;  %s1933_s26 = sadd.s32 1, %s3267_s21  ;;  %p2410_p7 = scmp.ne.s32.totalorder %s3063_s16, 2 }
  0x52   : > { %2513 = vmatprep.subr.bf16.mxu1 %v2965_v6  ;;  %v686_v10 = vand.u32 127, %v682_v7  ;;  %2724 = vset.pattern.permute.xlu1 %v2967_v11 }
  0x53   : > { %2725 = vset.pattern.permute.xlu0 %v2967_v11 }
  0x54   : > { %vm687_vm7 = vcmp.ge.s32.totalorder %v686_v10, 64  ;;  %vm688_vm8 = vcmp.lt.s32.totalorder %v686_v10, 96 }
  0x55   : > { %vm689_vm9 = vmand %vm687_vm7, %vm688_vm8 }
  0x56   : > { %2496 = vmatmul.mubr.msk.bf16.vlgmr.msra.gmra.mrb[4].mxu0 %vm470_vm2, %v575_v14  ;;  %v3255_v13 = vsel %vm689_vm9, 2.0, %v2968_v12 }
  0x57   : > { %2502 = vmatmul.mubr.msk.bf16.vlgmr.msra.gmra.mrb[4].mxu1 %vm470_vm2, %v623_v15  ;;  %2506 = vmatpush3.bf16.msra.mxu0 %v3195_v16  ;;  %v3258_v15 = vsel %vm689_vm9, -1.0, %v2965_v6 }
  0x58   : > { %2514 = vmatpush3.bf16.msra.mxu1 %v3200_v17  ;;  %2507 = vmatprep.subr.bf16.mxu0 %v2965_v6 }
  0x59   : > { %2515 = vmatprep.subr.bf16.mxu1 %v2965_v6  ;;  %2509 = vmatprep.mubr.msk.bf16.mxu0 %vm2966_vm1, %v2965_v6 }
  0x5a   : > { %2517 = vmatprep.mubr.msk.bf16.mxu1 %vm2966_vm1, %v2965_v6 }
  0x5b   : > { %2508 = vmatpush3.bf16.msra.mxu0 %v3210_v19 }
  0x5c   : > { %2516 = vmatpush3.bf16.msra.mxu1 %v3219_v21  ;;  %2521 = vmatprep.subr.bf16.mxu0 %v2965_v6 }
  0x5d   : > { %2529 = vmatprep.subr.bf16.mxu1 %v2965_v6 }
  0x5e   : > { %2510 = vmatmul.mubr.msk.bf16.vlgmr.msra.gmra.mrb[8].mxu0 %vm712_vm3, %v697_v20 }
  0x5f   : > { %2518 = vmatmul.mubr.msk.bf16.vlgmr.msra.gmra.mrb[8].mxu1 %vm712_vm3, %v765_v22  ;;  %2522 = vmatpush3.bf16.msra.mxu0 %v3195_v16 }
  0x60   : > { %2530 = vmatpush3.bf16.msra.mxu1 %v3200_v17  ;;  %2523 = vmatprep.subr.bf16.mxu0 %v2965_v6 }
  0x61   : > { %2531 = vmatprep.subr.bf16.mxu1 %v2965_v6  ;;  %2525 = vmatprep.mubr.msk.bf16.mxu0 %vm2966_vm1, %v2965_v6 }
  0x62   : > { %2533 = vmatprep.mubr.msk.bf16.mxu1 %vm2966_vm1, %v2965_v6 }
  0x63   : > { %2524 = vmatpush3.bf16.msra.mxu0 %v3210_v19 }
  0x64   : > { %2532 = vmatpush3.bf16.msra.mxu1 %v3219_v21  ;;  %2537 = vmatprep.subr.bf16.mxu0 %v2965_v6 }
  0x65   : > { %2545 = vmatprep.subr.bf16.mxu1 %v2965_v6 }
 0x121   : > { %v508_v25 = vpop.f32.mrb[0].mxu0 }
 0x122   : > { %v509_v26 = vadd.f32 %v2366_v23, %v508_v25  ;;  %v566_v27 = vpop.f32.mrb[0].mxu1  ;;  %v2485_v28 = vpop.f32.mrb[1].mxu0  ;;  %v3272_v25 = vshrl.u32 %v682_v7, 7 }
 0x123   : > { %v567_v29 = vadd.f32 %v2369_v24, %v566_v27  ;;  %v2491_v30 = vpop.f32.mrb[1].mxu1  ;;  %v511_v31 = vpop.f32.mrb[2].mxu0  ;;  %v871_v27 = vstv %s3275_s18  ;;  %v872_v28 = vstv %s870_s28  ;;  %s1229_s28 = sadd.s32 2, %s3275_s18 }
 0x124   : > { %514 = vst [vmem:[#allocation4] sm:$0xff] %v509_v26  ;;  %v569_v32 = vpop.f32.mrb[2].mxu1  ;;  %v2486_v33 = vpop.f32.mrb[3].mxu0  ;;  %vm684_vm10 = vcmp.lt.s32.totalorder %v3272_v25, 2 }
 0x125   : > { %572 = vst [vmem:[#allocation5] sm:$0xff] %v567_v29  ;;  %v2492_v34 = vpop.f32.mrb[3].mxu1  ;;  %v873_v30 = vsel %vm684_vm10, %v871_v27, %v872_v28  ;;  %v1052_v27 = vstv %s1050_s23  ;;  %v1053_v28 = vstv %s1051_s14  ;;  %s1230_s23 = sadd.s32 5, %s3267_s21  ;;  %s1406_s14 = sadd.s32 3, %s3275_s18 }
 0x129   : > { %v613_v35 = vpop.f32.mrb[4].mxu0 }
 0x12a   : > { %v614_v36 = vadd.f32 %v2366_v23, %v613_v35  ;;  %v661_v37 = vpop.f32.mrb[4].mxu1  ;;  %v2497_v38 = vpop.f32.mrb[5].mxu0  ;;  %v696_v23 = vld [vmem:[#allocation3] sm:$0xf] }
 0x12b   : > { %v662_v39 = vadd.f32 %v2369_v24, %v661_v37  ;;  %v2503_v40 = vpop.f32.mrb[5].mxu1  ;;  %v616_v41 = vpop.f32.mrb[6].mxu0  ;;  %v698_v59 = vld [vmem:[#allocation4] sm:$0x1] }
 0x12c   : > { %620 = vst [vmem:[#allocation4 + $0x8] sm:$0xff] %v614_v36  ;;  %v664_v42 = vpop.f32.mrb[6].mxu1  ;;  %v2498_v43 = vpop.f32.mrb[7].mxu0  ;;  %v762_v47 = vld [vmem:[#allocation5 + $0x7] sm:$0x1] }
 0x12d   : > { %668 = vst [vmem:[#allocation5 + $0x8] sm:$0xff] %v662_v39  ;;  %v2504_v44 = vpop.f32.mrb[7].mxu1  ;;  %v678_v24 = vld [vmem:[%s3893_s0] sm:$0x3]  ;;  %v2972_v39 = vmov 1983009808  }
 0x12e   : > { %v679_v26 = vrot.slane %v678_v24, 6  ;;  %v889_v40 = vunpack.c.l.s4 %v2972_v39 }
 0x130   : > { %v3281_v29 = vsel %vm680_vm6, %v678_v24, %v679_v26  ;;  %v890_v41 = vunpack.c.0.s8 %v889_v40 }
 0x131   : > { %v750_v45 = vpop.f32.mrb[8].mxu0  ;;  %vm874_vm11 = vcmp.lt.s32.totalorder %v873_v30, %v3281_v29 }
 0x132   : > { %v757_v46 = vrot.slane %v750_v45, 1  ;;  %v815_v48 = vpop.f32.mrb[8].mxu1  ;;  %v2511_v49 = vpop.f32.mrb[9].mxu0  ;;  %v760_v62 = vadd.f32 %v750_v45, %v698_v59  ;;  %v875_v33 = vsel %vm874_vm11, 1, %v2967_v11  ;;  %v3300_v43 = vsub.s32 %v890_v41, %v3272_v25  ;;  %v959_v59 = vld [vmem:[#allocation5 + $0x6] sm:$0x1] }
 0x133   : > { %v699_v50 = vld [vmem:[#allocation4 + $0x8] sm:$0x1]  ;;  %v822_v51 = vrot.slane %v815_v48, 1  ;;  %v825_v52 = vadd.f32 %v815_v48, %v762_v47  ;;  %v2519_v53 = vpop.f32.mrb[9].mxu1  ;;  %v753_v54 = vpop.f32.mrb[10].mxu0 }
 0x134   : > { %v761_v55 = vadd.f32 %v757_v46, %v699_v50  ;;  %v763_v56 = vld [vmem:[#allocation5 + $0xf] sm:$0x1]  ;;  %v818_v57 = vpop.f32.mrb[10].mxu1  ;;  %v2512_v58 = vpop.f32.mrb[11].mxu0 }
 0x135   : > { %v826_v60 = vadd.f32 %v822_v51, %v763_v56  ;;  %v2520_v61 = vpop.f32.mrb[11].mxu1  ;;  %v835_v0 = vrot.slane %v825_v52, 6  ;;  %v906_v57 = vld [vmem:[#allocation4 + $0x9] sm:$0x1] }
 0x136   : > { %v829_v63 = vrot.slane %v761_v55, 7 }
 0x137   : > { %v836_v1 = vrot.slane %v826_v60, 5 }
 0x138   : > { %v831_v2 = vsel %vm830_vm4, %v829_v63, %v760_v62 }
 0x139   : > { %v838_v3 = vsel %vm837_vm5, %v836_v1, %v835_v0 }
 0x13a   : > { %v840_v4 = vsel %vm680_vm6, %v831_v2, %v838_v3  ;;  %v960_v2 = vld [vmem:[#allocation5 + $0xe] sm:$0x1] }
 0x13b   : > { %v2388_v5 = vmul.f32 -1.442695, %v840_v4 }
 0x13d   : > { %2732 = vpow2.f32 %v2388_v5 }
 0x147   : > { %v2733_v8 = vpop.eup %2732 }
 0x148   : > { %v844_v9 = vadd.f32 1.0, %v2733_v8  ;;  %v905_v8 = vld [vmem:[#allocation4 + $0x1] sm:$0x1] }
 0x14a   : > { %2734 = vrcp.f32 %v844_v9 }
 0x154   : > { %v2735_v14 = vpop.eup %2734 }
 0x155   : > { %v847_v20 = vmul.f32 %v2735_v14, %v3255_v13 }
 0x157   : > { %v848_v22 = vadd.f32 %v847_v20, %v3258_v15 }
 0x159   : > { %855 = vrot.lane.b32.xlu0 %v848_v22, %s2969_s25 }
 0x15d   : > { %850 = vrot.lane.b32.xlu0 %v696_v23, %s2970_s27 }
 0x1cb   : > { %v856_v31 = vpop.permute.xlu0 %855 }
 0x1cc   : > { %v858_v32 = vmul.f32 %v856_v31, %v848_v22  ;;  %v1054_v31 = vsel %vm684_vm10, %v1052_v27, %v1053_v28 }
 0x1cd   : > { %vm1055_vm14 = vcmp.lt.s32.totalorder %v1054_v31, %v3281_v29 }
 0x1ce   : > { %860 = vrot.lane.b32.xlu1 %v858_v32, %s2970_s27 }
 0x1cf   : > { %v3290_v34 = vpop.permute.xlu0 %850 }
 0x1d0   : > { %v853_v35 = vmul.f32 %v3290_v34, %v848_v22 }
 0x1d2   : > { %877 = vperm.xlu1 %2724, %v875_v33  }
 0x1d6   : > { %881 = vrot.lane.b32.xlu1 %v3202_v18, %s3875_s22  ;;  %s2109_s22 = sadd.s32 7, %s3275_s18 }
 0x240   : > { %v861_v36 = vpop.permute.xlu1 %860 }
 0x241   : > { %v3293_v37 = vadd.f32 %v861_v36, %v853_v35  ;;  %v1056_v35 = vsel %vm1055_vm14, 1, %v2967_v11 }
 0x243   : > { %2736 = vtanh.f32 %v3293_v37 }
 0x24d   : > { %v2737_v38 = vpop.eup %2736 }
 0x24e   : > { %866 = vrot.lane.b32.xlu0 %v2737_v38, %s2969_s25 }
 0x251   : > { %v3297_v42 = vpop.permute.xlu1 %877 }
 0x252   : > { %vm879_vm12 = vcmp.eq.s32.totalorder %v3297_v42, 1 }
 0x253   : > { %v3350_v39 = vsel %vm879_vm12, %v3293_v37, %v3290_v34 }
 0x255   : > { %v882_v44 = vpop.permute.xlu1 %881 }
 0x2c0   : > { %v867_v18 = vpop.permute.xlu0 %866 }
 0x2c1   : > { %v869_v45 = vmul.f32 %v867_v18, %v848_v22 }
 0x2c3   : > { %v886_v46 = vsel %vm879_vm12, %v869_v45, 0.0  ;;  %v3307_v47 = vsel %vm879_vm12, %v869_v45, %v882_v44 }
 0x2c4   : > { %v3310_v48 = vrot.slane %v886_v46, %v3300_v43  ;;  %v904_v49 = vpack.c.bf16 %v3307_v47, %v3307_v47 }
 0x2c6   : > { %v900_v50 = vcombine.high %v3310_v48, %v3310_v48  ;;  %908 = vrot.lane.b32.xlu0 %v904_v49, %s2970_s27  ;;  %v961_v51 = vrot.slane %v904_v49, 1 }
 0x2c8   : > { %962 = vrot.lane.b32.xlu1 %v961_v51, %s2970_s27  ;;  %903 = vst.msk [vmem:[#allocation7 + $0x2] sm:$0x3] %vm902_vm13, %v900_v50 }
 0x338   : > { %v909_v52 = vpop.permute.xlu0 %908 }
 0x339   : > { %2526 = vmatmul.mubr.msk.bf16.vlgmr.msra.gmra.mrb[12].mxu0 %vm712_vm3, %v909_v52 }
 0x33a   : > { %v963_v53 = vpop.permute.xlu1 %962  ;;  %2538 = vmatpush3.bf16.msra.mxu0 %v3195_v16  ;;  %2541 = vmatprep.mubr.msk.bf16.mxu0 %vm2966_vm1, %v2965_v6 }
 0x33b   : > { %2534 = vmatmul.mubr.msk.bf16.vlgmr.msra.gmra.mrb[12].mxu1 %vm712_vm3, %v963_v53  ;;  %2539 = vmatprep.subr.bf16.mxu0 %v2965_v6 }
 0x33c   : > { %2546 = vmatpush3.bf16.msra.mxu1 %v3200_v17  ;;  %2549 = vmatprep.mubr.msk.bf16.mxu1 %vm2966_vm1, %v2965_v6 }
 0x33d   : > { %2547 = vmatprep.subr.bf16.mxu1 %v2965_v6 }
 0x33e   : > { %2540 = vmatpush3.bf16.msra.mxu0 %v3210_v19 }
 0x33f   : > { %2553 = vmatprep.subr.bf16.mxu0 %v2965_v6 }
 0x340   : > { %2548 = vmatpush3.bf16.msra.mxu1 %v3219_v21 }
 0x341   : > { %2561 = vmatprep.subr.bf16.mxu1 %v2965_v6 }
 0x40c   : > { %v947_v54 = vpop.f32.mrb[12].mxu0 }
 0x40d   : > { %v954_v55 = vrot.slane %v947_v54, 1  ;;  %v2527_v56 = vpop.f32.mrb[13].mxu0  ;;  %v957_v9 = vadd.f32 %v947_v54, %v905_v8  ;;  %v1085_v54 = vld [vmem:[#allocation4 + $0xa] sm:$0x1] }
 0x40e   : > { %v950_v58 = vpop.f32.mrb[14].mxu0  ;;  %v1001_v60 = vpop.f32.mrb[12].mxu1  ;;  %v1138_v56 = vld [vmem:[#allocation5 + $0x5] sm:$0x1] }
 0x40f   : > { %v958_v61 = vadd.f32 %v954_v55, %v906_v57  ;;  %v1008_v62 = vrot.slane %v1001_v60, 1  ;;  %v1011_v63 = vadd.f32 %v1001_v60, %v959_v59  ;;  %v2528_v0 = vpop.f32.mrb[15].mxu0  ;;  %v2535_v1 = vpop.f32.mrb[13].mxu1 }
 0x410   : > { %v1004_v3 = vpop.f32.mrb[14].mxu1 }
 0x411   : > { %v1015_v4 = vrot.slane %v958_v61, 7  ;;  %v1012_v5 = vadd.f32 %v1008_v62, %v960_v2  ;;  %v2536_v7 = vpop.f32.mrb[15].mxu1  ;;  %v1020_v10 = vrot.slane %v1011_v63, 6  ;;  %v1139_v63 = vld [vmem:[#allocation5 + $0xd] sm:$0x1] }
 0x413   : > { %v1021_v12 = vrot.slane %v1012_v5, 5  ;;  %v1016_v14 = vsel %vm830_vm4, %v1015_v4, %v957_v9  ;;  %v1084_v4 = vld [vmem:[#allocation4 + $0x2] sm:$0x1] }
 0x415   : > { %v1022_v20 = vsel %vm837_vm5, %v1021_v12, %v1020_v10 }
 0x416   : > { %v1024_v22 = vsel %vm680_vm6, %v1016_v14, %v1022_v20 }
 0x417   : > { %v2391_v23 = vmul.f32 -1.442695, %v1024_v22 }
 0x419   : > { %2738 = vpow2.f32 %v2391_v23  ;;  %v1231_v23 = vstv %s1229_s28  ;;  %s1407_s28 = sadd.s32 4, %s3267_s21 }
 0x423   : > { %v2739_v24 = vpop.eup %2738 }
 0x424   : > { %v1028_v26 = vadd.f32 1.0, %v2739_v24  ;;  %v1232_v24 = vstv %s1230_s23  ;;  %s1580_s23 = sadd.s32 4, %s3275_s18 }
 0x425   : > { %v1233_v27 = vsel %vm684_vm10, %v1231_v23, %v1232_v24  ;;  %v1409_v23 = vstv %s1407_s28  ;;  %s1755_s28 = sadd.s32 5, %s3275_s18 }
 0x426   : > { %2740 = vrcp.f32 %v1028_v26  ;;  %vm1234_vm0 = vcmp.lt.s32.totalorder %v1233_v27, %v3281_v29 }
 0x427   : > { %v1235_v31 = vsel %vm1234_vm0, 1, %v2967_v11 }
 0x430   : > { %v2741_v30 = vpop.eup %2740 }
 0x431   : > { %v1031_v32 = vmul.f32 %v2741_v30, %v3255_v13 }
 0x433   : > { %v1032_v33 = vadd.f32 %v1031_v32, %v3258_v15 }
 0x435   : > { %1035 = vrot.lane.b32.xlu0 %v1032_v33, %s2969_s25  ;;  %v1033_v40 = vmul.f32 %v1032_v33, %v3350_v39 }
 0x439   : > { %1058 = vperm.xlu0 %2725, %v1056_v35  }
 0x4a7   : > { %v1036_v36 = vpop.permute.xlu0 %1035 }
 0x4a8   : > { %v1038_v38 = vmul.f32 %v1036_v36, %v1032_v33 }
 0x4aa   : > { %1040 = vrot.lane.b32.xlu1 %v1038_v38, %s2970_s27 }
 0x4b8   : > { %v3357_v45 = vpop.permute.xlu0 %1058 }
 0x4b9   : > { %vm1060_vm15 = vcmp.eq.s32.totalorder %v3357_v45, 1 }
 0x51c   : > { %v1041_v41 = vpop.permute.xlu1 %1040 }
 0x51d   : > { %v3353_v18 = vadd.f32 %v1041_v41, %v1033_v40 }
 0x51f   : > { %2742 = vtanh.f32 %v3353_v18  ;;  %v3403_v35 = vsel %vm1060_vm15, %v3353_v18, %v3350_v39 }
 0x529   : > { %v2743_v44 = vpop.eup %2742 }
 0x52a   : > { %1046 = vrot.lane.b32.xlu1 %v2743_v44, %s2969_s25 }
 0x59c   : > { %v1047_v46 = vpop.permute.xlu1 %1046 }
 0x59d   : > { %v3359_v49 = vmul.f32 %v1047_v46, %v1032_v33 }
 0x59f   : > { %v3366_v34 = vsel %vm1060_vm15, %v3359_v49, %v3307_v47 }
 0x5a0   : > { %v1083_v37 = vpack.c.bf16 %v3366_v34, %v3366_v34 }
 0x5a2   : > { %1087 = vrot.lane.b32.xlu1 %v1083_v37, %s2970_s27  ;;  %v1140_v42 = vrot.slane %v1083_v37, 1 }
 0x5a4   : > { %1141 = vrot.lane.b32.xlu0 %v1140_v42, %s2970_s27 }
 0x614   : > { %v1088_v50 = vpop.permute.xlu1 %1087 }
 0x615   : > { %2542 = vmatmul.mubr.msk.bf16.vlgmr.msra.gmra.mrb[16].mxu0 %vm712_vm3, %v1088_v50 }
 0x616   : > { %v1142_v51 = vpop.permute.xlu0 %1141  ;;  %2554 = vmatpush3.bf16.msra.mxu0 %v3195_v16  ;;  %2557 = vmatprep.mubr.msk.bf16.mxu0 %vm2966_vm1, %v2965_v6 }
 0x617   : > { %2550 = vmatmul.mubr.msk.bf16.vlgmr.msra.gmra.mrb[16].mxu1 %vm712_vm3, %v1142_v51  ;;  %2555 = vmatprep.subr.bf16.mxu0 %v2965_v6 }
 0x618   : > { %2562 = vmatpush3.bf16.msra.mxu1 %v3200_v17  ;;  %2565 = vmatprep.mubr.msk.bf16.mxu1 %vm2966_vm1, %v2965_v6 }
 0x619   : > { %2563 = vmatprep.subr.bf16.mxu1 %v2965_v6 }
 0x61a   : > { %2556 = vmatpush3.bf16.msra.mxu0 %v3210_v19 }
 0x61b   : > { %2569 = vmatprep.subr.bf16.mxu0 %v2965_v6 }
 0x61c   : > { %2564 = vmatpush3.bf16.msra.mxu1 %v3219_v21 }
 0x61d   : > { %2577 = vmatprep.subr.bf16.mxu1 %v2965_v6 }
 0x6e8   : > { %v1126_v47 = vpop.f32.mrb[16].mxu0 }
 0x6e9   : > { %v1133_v52 = vrot.slane %v1126_v47, 1  ;;  %v2543_v53 = vpop.f32.mrb[17].mxu0  ;;  %v1136_v5 = vadd.f32 %v1126_v47, %v1084_v4 }
 0x6ea   : > { %v1129_v55 = vpop.f32.mrb[18].mxu0  ;;  %v1180_v57 = vpop.f32.mrb[16].mxu1  ;;  %v1262_v53 = vld [vmem:[#allocation4 + $0xb] sm:$0x1] }
 0x6eb   : > { %v1137_v58 = vadd.f32 %v1133_v52, %v1085_v54  ;;  %v1187_v59 = vrot.slane %v1180_v57, 1  ;;  %v1190_v60 = vadd.f32 %v1180_v57, %v1138_v56  ;;  %v2544_v61 = vpop.f32.mrb[19].mxu0  ;;  %v2551_v62 = vpop.f32.mrb[17].mxu1  ;;  %v1315_v55 = vld [vmem:[#allocation5 + $0x4] sm:$0x1] }
 0x6ec   : > { %v1183_v0 = vpop.f32.mrb[18].mxu1  ;;  %v1316_v62 = vld [vmem:[#allocation5 + $0xc] sm:$0x1] }
 0x6ed   : > { %v1194_v1 = vrot.slane %v1137_v58, 7  ;;  %v1191_v2 = vadd.f32 %v1187_v59, %v1139_v63  ;;  %v2552_v3 = vpop.f32.mrb[19].mxu1  ;;  %v1199_v7 = vrot.slane %v1190_v60, 6 }
 0x6ee   : > { %v1261_v3 = vld [vmem:[#allocation4 + $0x3] sm:$0x1] }
 0x6ef   : > { %v1200_v8 = vrot.slane %v1191_v2, 5  ;;  %v1195_v9 = vsel %vm830_vm4, %v1194_v1, %v1136_v5 }
 0x6f1   : > { %v1201_v10 = vsel %vm837_vm5, %v1200_v8, %v1199_v7 }
 0x6f2   : > { %v1203_v12 = vsel %vm680_vm6, %v1195_v9, %v1201_v10 }
 0x6f3   : > { %v2394_v14 = vmul.f32 -1.442695, %v1203_v12 }
 0x6f5   : > { %2744 = vpow2.f32 %v2394_v14 }
 0x6ff   : > { %v2745_v20 = vpop.eup %2744 }
 0x700   : > { %v1207_v22 = vadd.f32 1.0, %v2745_v20 }
 0x702   : > { %2746 = vrcp.f32 %v1207_v22  ;;  %v1408_v22 = vstv %s1406_s14  ;;  %s1581_s14 = sadd.s32 3, %s3267_s21 }
 0x70c   : > { %v2747_v26 = vpop.eup %2746 }
 0x70d   : > { %v1210_v28 = vmul.f32 %v2747_v26, %v3255_v13  ;;  %v1410_v26 = vsel %vm684_vm10, %v1408_v22, %v1409_v23  ;;  %v1582_v23 = vstv %s1580_s23  ;;  %s1756_s23 = sadd.s32 2, %s3267_s21 }
 0x70e   : > { %vm1411_vm7 = vcmp.lt.s32.totalorder %v1410_v26, %v3281_v29 }
 0x70f   : > { %v1211_v30 = vadd.f32 %v1210_v28, %v3258_v15 }
 0x711   : > { %1214 = vrot.lane.b32.xlu1 %v1211_v30, %s2969_s25  ;;  %v1212_v36 = vmul.f32 %v1211_v30, %v3403_v35 }
 0x715   : > { %1237 = vperm.xlu1 %2724, %v1235_v31  }
 0x783   : > { %v1215_v32 = vpop.permute.xlu1 %1214 }
 0x784   : > { %v1217_v33 = vmul.f32 %v1215_v32, %v1211_v30 }
 0x786   : > { %1219 = vrot.lane.b32.xlu0 %v1217_v33, %s2970_s27 }
 0x794   : > { %v3410_v44 = vpop.permute.xlu1 %1237 }
 0x795   : > { %vm1239_vm2 = vcmp.eq.s32.totalorder %v3410_v44, 1 }
 0x7f8   : > { %v1220_v38 = vpop.permute.xlu0 %1219 }
 0x7f9   : > { %v3406_v40 = vadd.f32 %v1220_v38, %v1212_v36 }
 0x7fb   : > { %2748 = vtanh.f32 %v3406_v40  ;;  %v3456_v33 = vsel %vm1239_vm2, %v3406_v40, %v3403_v35 }
 0x805   : > { %v2749_v41 = vpop.eup %2748 }
 0x806   : > { %1225 = vrot.lane.b32.xlu0 %v2749_v41, %s2969_s25 }
 0x878   : > { %v1226_v46 = vpop.permute.xlu0 %1225 }
 0x879   : > { %v3412_v37 = vmul.f32 %v1226_v46, %v1211_v30  ;;  %v1412_v30 = vsel %vm1411_vm7, 1, %v2967_v11 }
 0x87b   : > { %v3419_v39 = vsel %vm1239_vm2, %v3412_v37, %v3366_v34 }
 0x87c   : > { %v1260_v18 = vpack.c.bf16 %v3419_v39, %v3419_v39 }
 0x87e   : > { %1264 = vrot.lane.b32.xlu1 %v1260_v18, %s2970_s27  ;;  %v1317_v42 = vrot.slane %v1260_v18, 1 }
 0x880   : > { %1318 = vrot.lane.b32.xlu0 %v1317_v42, %s2970_s27 }
 0x8f0   : > { %v1265_v50 = vpop.permute.xlu1 %1264 }
 0x8f1   : > { %2558 = vmatmul.mubr.msk.bf16.vlgmr.msra.gmra.mrb[20].mxu0 %vm712_vm3, %v1265_v50 }
 0x8f2   : > { %v1319_v51 = vpop.permute.xlu0 %1318  ;;  %2570 = vmatpush3.bf16.msra.mxu0 %v3195_v16  ;;  %2573 = vmatprep.mubr.msk.bf16.mxu0 %vm2966_vm1, %v2965_v6 }
 0x8f3   : > { %2566 = vmatmul.mubr.msk.bf16.vlgmr.msra.gmra.mrb[20].mxu1 %vm712_vm3, %v1319_v51  ;;  %2571 = vmatprep.subr.bf16.mxu0 %v2965_v6 }
 0x8f4   : > { %2578 = vmatpush3.bf16.msra.mxu1 %v3200_v17  ;;  %2581 = vmatprep.mubr.msk.bf16.mxu1 %vm2966_vm1, %v2965_v6 }
 0x8f5   : > { %2579 = vmatprep.subr.bf16.mxu1 %v2965_v6 }
 0x8f6   : > { %2572 = vmatpush3.bf16.msra.mxu0 %v3210_v19 }
 0x8f7   : > { %2585 = vmatprep.subr.bf16.mxu0 %v2965_v6 }
 0x8f8   : > { %2580 = vmatpush3.bf16.msra.mxu1 %v3219_v21 }
 0x8f9   : > { %2593 = vmatprep.subr.bf16.mxu1 %v2965_v6 }
 0x9c4   : > { %v1303_v34 = vpop.f32.mrb[20].mxu0 }
 0x9c5   : > { %v1310_v47 = vrot.slane %v1303_v34, 1  ;;  %v2559_v52 = vpop.f32.mrb[21].mxu0  ;;  %v1313_v4 = vadd.f32 %v1303_v34, %v1261_v3 }
 0x9c6   : > { %v1306_v54 = vpop.f32.mrb[22].mxu0  ;;  %v1357_v56 = vpop.f32.mrb[20].mxu1 }
 0x9c7   : > { %v1314_v57 = vadd.f32 %v1310_v47, %v1262_v53  ;;  %v1364_v58 = vrot.slane %v1357_v56, 1  ;;  %v1367_v59 = vadd.f32 %v1357_v56, %v1315_v55  ;;  %v2560_v60 = vpop.f32.mrb[23].mxu0  ;;  %v2567_v61 = vpop.f32.mrb[21].mxu1  ;;  %v1436_v54 = vld [vmem:[#allocation4 + $0xc] sm:$0x1] }
 0x9c8   : > { %v1360_v63 = vpop.f32.mrb[22].mxu1  ;;  %v1489_v56 = vld [vmem:[#allocation5 + $0x3] sm:$0x1] }
 0x9c9   : > { %v1371_v0 = vrot.slane %v1314_v57, 7  ;;  %v1368_v1 = vadd.f32 %v1364_v58, %v1316_v62  ;;  %v2568_v2 = vpop.f32.mrb[23].mxu1  ;;  %v1376_v5 = vrot.slane %v1367_v59, 6  ;;  %v1490_v63 = vld [vmem:[#allocation5 + $0xb] sm:$0x1] }
 0x9cb   : > { %v1377_v7 = vrot.slane %v1368_v1, 5  ;;  %v1372_v8 = vsel %vm830_vm4, %v1371_v0, %v1313_v4  ;;  %v1435_v4 = vld [vmem:[#allocation4 + $0x4] sm:$0x1] }
 0x9cd   : > { %v1378_v9 = vsel %vm837_vm5, %v1377_v7, %v1376_v5 }
 0x9ce   : > { %v1380_v10 = vsel %vm680_vm6, %v1372_v8, %v1378_v9 }
 0x9cf   : > { %v2397_v12 = vmul.f32 -1.442695, %v1380_v10 }
 0x9d1   : > { %2750 = vpow2.f32 %v2397_v12 }
 0x9db   : > { %v2751_v14 = vpop.eup %2750 }
 0x9dc   : > { %v1384_v20 = vadd.f32 1.0, %v2751_v14 }
 0x9de   : > { %2752 = vrcp.f32 %v1384_v20 }
 0x9e8   : > { %v2753_v24 = vpop.eup %2752 }
 0x9e9   : > { %v1387_v27 = vmul.f32 %v2753_v24, %v3255_v13  ;;  %v1583_v24 = vstv %s1581_s14 }
 0x9eb   : > { %v1388_v28 = vadd.f32 %v1387_v27, %v3258_v15  ;;  %v1584_v27 = vsel %vm684_vm10, %v1582_v23, %v1583_v24 }
 0x9ec   : > { %vm1585_vm9 = vcmp.lt.s32.totalorder %v1584_v27, %v3281_v29  ;;  %v1758_v27 = vstv %s1756_s23 }
 0x9ed   : > { %1391 = vrot.lane.b32.xlu1 %v1388_v28, %s2969_s25  ;;  %v1389_v36 = vmul.f32 %v1388_v28, %v3456_v33 }
 0x9f1   : > { %1414 = vperm.xlu1 %2724, %v1412_v30  }
 0xa5f   : > { %v1392_v31 = vpop.permute.xlu1 %1391 }
 0xa60   : > { %v1394_v32 = vmul.f32 %v1392_v31, %v1388_v28  ;;  %v1586_v31 = vsel %vm1585_vm9, 1, %v2967_v11 }
 0xa62   : > { %1396 = vrot.lane.b32.xlu0 %v1394_v32, %s2970_s27 }
 0xa70   : > { %v3463_v18 = vpop.permute.xlu1 %1414 }
 0xa71   : > { %vm1416_vm8 = vcmp.eq.s32.totalorder %v3463_v18, 1 }
 0xad4   : > { %v1397_v38 = vpop.permute.xlu0 %1396 }
 0xad5   : > { %v3459_v41 = vadd.f32 %v1397_v38, %v1389_v36 }
 0xad7   : > { %2754 = vtanh.f32 %v3459_v41  ;;  %v3509_v38 = vsel %vm1416_vm8, %v3459_v41, %v3456_v33 }
 0xae1   : > { %v2755_v46 = vpop.eup %2754 }
 0xae2   : > { %1402 = vrot.lane.b32.xlu0 %v2755_v46, %s2969_s25 }
 0xb54   : > { %v1403_v42 = vpop.permute.xlu0 %1402 }
 0xb55   : > { %v3465_v50 = vmul.f32 %v1403_v42, %v1388_v28 }
 0xb57   : > { %v3472_v35 = vsel %vm1416_vm8, %v3465_v50, %v3419_v39 }
 0xb58   : > { %v1434_v40 = vpack.c.bf16 %v3472_v35, %v3472_v35 }
 0xb5a   : > { %1438 = vrot.lane.b32.xlu1 %v1434_v40, %s2970_s27  ;;  %v1491_v51 = vrot.slane %v1434_v40, 1 }
 0xb5c   : > { %1492 = vrot.lane.b32.xlu0 %v1491_v51, %s2970_s27 }
 0xbcc   : > { %v1439_v34 = vpop.permute.xlu1 %1438 }
 0xbcd   : > { %2574 = vmatmul.mubr.msk.bf16.vlgmr.msra.gmra.mrb[24].mxu0 %vm712_vm3, %v1439_v34 }
 0xbce   : > { %v1493_v47 = vpop.permute.xlu0 %1492  ;;  %2586 = vmatpush3.bf16.msra.mxu0 %v3195_v16  ;;  %2589 = vmatprep.mubr.msk.bf16.mxu0 %vm2966_vm1, %v2965_v6 }
 0xbcf   : > { %2582 = vmatmul.mubr.msk.bf16.vlgmr.msra.gmra.mrb[24].mxu1 %vm712_vm3, %v1493_v47  ;;  %2587 = vmatprep.subr.bf16.mxu0 %v2965_v6 }
 0xbd0   : > { %2594 = vmatpush3.bf16.msra.mxu1 %v3200_v17  ;;  %2597 = vmatprep.mubr.msk.bf16.mxu1 %vm2966_vm1, %v2965_v6 }
 0xbd1   : > { %2595 = vmatprep.subr.bf16.mxu1 %v2965_v6 }
 0xbd2   : > { %2588 = vmatpush3.bf16.msra.mxu0 %v3210_v19 }
 0xbd3   : > { %2601 = vmatprep.subr.bf16.mxu0 %v2965_v6 }
 0xbd4   : > { %2596 = vmatpush3.bf16.msra.mxu1 %v3219_v21 }
 0xbd5   : > { %2609 = vmatprep.subr.bf16.mxu1 %v2965_v6 }
 0xca0   : > { %v1477_v39 = vpop.f32.mrb[24].mxu0 }
 0xca1   : > { %v1484_v52 = vrot.slane %v1477_v39, 1  ;;  %v2575_v53 = vpop.f32.mrb[25].mxu0  ;;  %v1487_v5 = vadd.f32 %v1477_v39, %v1435_v4 }
 0xca2   : > { %v1480_v55 = vpop.f32.mrb[26].mxu0  ;;  %v1531_v57 = vpop.f32.mrb[24].mxu1 }
 0xca3   : > { %v1488_v58 = vadd.f32 %v1484_v52, %v1436_v54  ;;  %v1538_v59 = vrot.slane %v1531_v57, 1  ;;  %v1541_v60 = vadd.f32 %v1531_v57, %v1489_v56  ;;  %v2576_v61 = vpop.f32.mrb[27].mxu0  ;;  %v2583_v62 = vpop.f32.mrb[25].mxu1 }
 0xca4   : > { %v1534_v0 = vpop.f32.mrb[26].mxu1  ;;  %v1664_v61 = vld [vmem:[#allocation5 + $0x2] sm:$0x1] }
 0xca5   : > { %v1545_v1 = vrot.slane %v1488_v58, 7  ;;  %v1542_v2 = vadd.f32 %v1538_v59, %v1490_v63  ;;  %v2584_v3 = vpop.f32.mrb[27].mxu1  ;;  %v1550_v7 = vrot.slane %v1541_v60, 6  ;;  %v1611_v59 = vld [vmem:[#allocation4 + $0xd] sm:$0x1] }
 0xca6   : > { %v1665_v3 = vld [vmem:[#allocation5 + $0xa] sm:$0x1] }
 0xca7   : > { %v1551_v8 = vrot.slane %v1542_v2, 5  ;;  %v1546_v9 = vsel %vm830_vm4, %v1545_v1, %v1487_v5 }
 0xca9   : > { %v1552_v10 = vsel %vm837_vm5, %v1551_v8, %v1550_v7  ;;  %v1610_v7 = vld [vmem:[#allocation4 + $0x5] sm:$0x1] }
 0xcaa   : > { %v1554_v12 = vsel %vm680_vm6, %v1546_v9, %v1552_v10 }
 0xcab   : > { %v2400_v14 = vmul.f32 -1.442695, %v1554_v12 }
 0xcad   : > { %2756 = vpow2.f32 %v2400_v14 }
 0xcb7   : > { %v2757_v20 = vpop.eup %2756 }
 0xcb8   : > { %v1558_v22 = vadd.f32 1.0, %v2757_v20 }
 0xcba   : > { %2758 = vrcp.f32 %v1558_v22 }
 0xcc4   : > { %v2759_v26 = vpop.eup %2758 }
 0xcc5   : > { %v1561_v28 = vmul.f32 %v2759_v26, %v3255_v13  ;;  %v1757_v26 = vstv %s1755_s28 }
 0xcc7   : > { %v1562_v30 = vadd.f32 %v1561_v28, %v3258_v15 }
 0xcc9   : > { %1565 = vrot.lane.b32.xlu1 %v1562_v30, %s2969_s25  ;;  %v1563_v46 = vmul.f32 %v1562_v30, %v3509_v38 }
 0xccd   : > { %1588 = vperm.xlu1 %2724, %v1586_v31  }
 0xd3b   : > { %v1566_v32 = vpop.permute.xlu1 %1565 }
 0xd3c   : > { %v1568_v36 = vmul.f32 %v1566_v32, %v1562_v30 }
 0xd3e   : > { %1570 = vrot.lane.b32.xlu0 %v1568_v36, %s2970_s27 }
 0xd4c   : > { %v3516_v34 = vpop.permute.xlu1 %1588 }
 0xd4d   : > { %vm1590_vm11 = vcmp.eq.s32.totalorder %v3516_v34, 1 }
 0xdb0   : > { %v1571_v42 = vpop.permute.xlu0 %1570 }
 0xdb1   : > { %v3512_v40 = vadd.f32 %v1571_v42, %v1563_v46 }
 0xdb3   : > { %2760 = vtanh.f32 %v3512_v40 }
 0xdbd   : > { %v2761_v51 = vpop.eup %2760 }
 0xdbe   : > { %1576 = vrot.lane.b32.xlu0 %v2761_v51, %s2969_s25  ;;  %v3567_v51 = vsel %vm1590_vm11, %v3512_v40, %v3509_v38 }
 0xe30   : > { %v1577_v47 = vpop.permute.xlu0 %1576 }
 0xe31   : > { %v1579_v39 = vmul.f32 %v1577_v47, %v1562_v30  ;;  %v1759_v30 = vsel %vm684_vm10, %v1757_v26, %v1758_v27 }
 0xe32   : > { %vm1760_vm12 = vcmp.lt.s32.totalorder %v1759_v30, %v3281_v29  ;;  %v1934_v30 = vstv %s1932_s24 }
 0xe33   : > { %v1593_v33 = vsel %vm1590_vm11, %v1579_v39, 0.0  ;;  %v3524_v41 = vsel %vm1590_vm11, %v1579_v39, %v3472_v35  ;;  %v1761_v36 = vsel %vm1760_vm12, 1, %v2967_v11 }
 0xe34   : > { %v3527_v52 = vrot.slane %v1593_v33, %v3300_v43  ;;  %v1609_v53 = vpack.c.bf16 %v3524_v41, %v3524_v41 }
 0xe36   : > { %v1606_v54 = vcombine.high %v3527_v52, %v3527_v52  ;;  %1613 = vrot.lane.b32.xlu1 %v1609_v53, %s2970_s27  ;;  %v1666_v55 = vrot.slane %v1609_v53, 1 }
 0xe38   : > { %1667 = vrot.lane.b32.xlu0 %v1666_v55, %s2970_s27  ;;  %1608 = vst.msk [vmem:[#allocation7] sm:$0x3] %vm902_vm13, %v1606_v54 }
 0xea8   : > { %v1614_v56 = vpop.permute.xlu1 %1613 }
 0xea9   : > { %2590 = vmatmul.mubr.msk.bf16.vlgmr.msra.gmra.mrb[28].mxu0 %vm712_vm3, %v1614_v56 }
 0xeaa   : > { %v1668_v35 = vpop.permute.xlu0 %1667  ;;  %2602 = vmatpush3.bf16.msra.mxu0 %v3195_v16  ;;  %2605 = vmatprep.mubr.msk.bf16.mxu0 %vm2966_vm1, %v2965_v6 }
 0xeab   : > { %2598 = vmatmul.mubr.msk.bf16.vlgmr.msra.gmra.mrb[28].mxu1 %vm712_vm3, %v1668_v35  ;;  %2603 = vmatprep.subr.bf16.mxu0 %v2965_v6 }
 0xeac   : > { %2610 = vmatpush3.bf16.msra.mxu1 %v3200_v17  ;;  %2613 = vmatprep.mubr.msk.bf16.mxu1 %vm2966_vm1, %v2965_v6 }
 0xead   : > { %2611 = vmatprep.subr.bf16.mxu1 %v2965_v6 }
 0xeae   : > { %2604 = vmatpush3.bf16.msra.mxu0 %v3210_v19 }
 0xeaf   : > { %2617 = vmatprep.subr.bf16.mxu0 %v2965_v6 }
 0xeb0   : > { %2612 = vmatpush3.bf16.msra.mxu1 %v3219_v21 }
 0xeb1   : > { %2625 = vmatprep.subr.bf16.mxu1 %v2965_v6 }
 0xf7c   : > { %v1652_v16 = vpop.f32.mrb[28].mxu0 }
 0xf7d   : > { %v1659_v57 = vrot.slane %v1652_v16, 1  ;;  %v2591_v58 = vpop.f32.mrb[29].mxu0  ;;  %v1662_v8 = vadd.f32 %v1652_v16, %v1610_v7 }
 0xf7e   : > { %v1655_v60 = vpop.f32.mrb[30].mxu0  ;;  %v1706_v17 = vpop.f32.mrb[28].mxu1  ;;  %v2782_v58 = vld [vmem:[%s3861_s4 + $0x8] sm:$0xff]  }
 0xf7f   : > { %v1663_v62 = vadd.f32 %v1659_v57, %v1611_v59  ;;  %v1713_v63 = vrot.slane %v1706_v17, 1  ;;  %v1716_v0 = vadd.f32 %v1706_v17, %v1664_v61  ;;  %v2592_v1 = vpop.f32.mrb[31].mxu0  ;;  %v2599_v2 = vpop.f32.mrb[29].mxu1  ;;  %v2780_v57 = vld [vmem:[%s3861_s4] sm:$0xff]   ;;  %v2783_v59 = vld [vmem:[%s3861_s4 + $0x18] sm:$0xff]  }
 0xf80   : > { %v1709_v19 = vpop.f32.mrb[30].mxu1 }
 0xf81   : > { %v1720_v4 = vrot.slane %v1663_v62, 7  ;;  %v1717_v21 = vadd.f32 %v1713_v63, %v1665_v3  ;;  %v2600_v5 = vpop.f32.mrb[31].mxu1  ;;  %v1725_v9 = vrot.slane %v1716_v0, 6  ;;  %v1788_v62 = vld [vmem:[#allocation4 + $0xe] sm:$0x1] }
 0xf82   : > { %v1841_v0 = vld [vmem:[#allocation5 + $0x1] sm:$0x1] }
 0xf83   : > { %v1726_v10 = vrot.slane %v1717_v21, 5  ;;  %v1721_v12 = vsel %vm830_vm4, %v1720_v4, %v1662_v8  ;;  %v1842_v21 = vld [vmem:[#allocation5 + $0x9] sm:$0x1] }
 0xf85   : > { %v1727_v14 = vsel %vm837_vm5, %v1726_v10, %v1725_v9  ;;  %v1787_v10 = vld [vmem:[#allocation4 + $0x6] sm:$0x1] }
 0xf86   : > { %v1729_v20 = vsel %vm680_vm6, %v1721_v12, %v1727_v14 }
 0xf87   : > { %v2403_v22 = vmul.f32 -1.442695, %v1729_v20 }
 0xf89   : > { %2762 = vpow2.f32 %v2403_v22 }
 0xf93   : > { %v2763_v23 = vpop.eup %2762 }
 0xf94   : > { %v1733_v24 = vadd.f32 1.0, %v2763_v23 }
 0xf96   : > { %2764 = vrcp.f32 %v1733_v24 }
 0xfa0   : > { %v2765_v28 = vpop.eup %2764 }
 0xfa1   : > { %v1736_v31 = vmul.f32 %v2765_v28, %v3255_v13 }
 0xfa3   : > { %v1737_v32 = vadd.f32 %v1736_v31, %v3258_v15  ;;  %v1935_v31 = vstv %s1933_s26 }
 0xfa5   : > { %1740 = vrot.lane.b32.xlu1 %v1737_v32, %s2969_s25  ;;  %v1738_v47 = vmul.f32 %v1737_v32, %v3567_v51 }
 0xfa9   : > { %1763 = vperm.xlu1 %2724, %v1761_v36   ;;  %v1936_v36 = vsel %vm684_vm10, %v1934_v30, %v1935_v31  ;;  %v2110_v31 = vstv %s2109_s22 }
0x1017   : > { %v1741_v46 = vpop.permute.xlu1 %1740 }
0x1018   : > { %v1743_v42 = vmul.f32 %v1741_v46, %v1737_v32 }
0x101a   : > { %1745 = vrot.lane.b32.xlu0 %v1743_v42, %s2970_s27 }
0x1028   : > { %v3574_v54 = vpop.permute.xlu1 %1763 }
0x1029   : > { %vm1765_vm14 = vcmp.eq.s32.totalorder %v3574_v54, 1 }
0x108c   : > { %v1746_v39 = vpop.permute.xlu0 %1745 }
0x108d   : > { %v3570_v33 = vadd.f32 %v1746_v39, %v1738_v47 }
0x108f   : > { %2766 = vtanh.f32 %v3570_v33 }
0x1099   : > { %v2767_v53 = vpop.eup %2766 }
0x109a   : > { %1751 = vrot.lane.b32.xlu0 %v2767_v53, %s2969_s25 }
0x110c   : > { %v1752_v55 = vpop.permute.xlu0 %1751 }
0x110d   : > { %v3576_v56 = vmul.f32 %v1752_v55, %v1737_v32  ;;  %v3626_v55 = vsel %vm1765_vm14, %v3570_v33, %v3567_v51 }
0x110f   : > { %v3583_v38 = vsel %vm1765_vm14, %v3576_v56, %v3524_v41  ;;  %v2781_v41 = vld [vmem:[%s3861_s4 + $0x10] sm:$0xff]  }
0x1110   : > { %v1786_v40 = vpack.c.bf16 %v3583_v38, %v3583_v38 }
0x1112   : > { %1790 = vrot.lane.b32.xlu1 %v1786_v40, %s2970_s27  ;;  %v1843_v34 = vrot.slane %v1786_v40, 1 }
0x1114   : > { %1844 = vrot.lane.b32.xlu0 %v1843_v34, %s2970_s27 }
0x1184   : > { %v1791_v35 = vpop.permute.xlu1 %1790 }
0x1185   : > { %2606 = vmatmul.mubr.msk.bf16.vlgmr.msra.gmra.mrb[32].mxu0 %vm712_vm3, %v1791_v35 }
0x1186   : > { %v1845_v16 = vpop.permute.xlu0 %1844  ;;  %2618 = vmatpush3.bf16.msra.mxu0 %v2780_v57  ;;  %2621 = vmatprep.mubr.msk.bf16.mxu0 %vm2966_vm1, %v2965_v6 }
0x1187   : > { %2614 = vmatmul.mubr.msk.bf16.vlgmr.msra.gmra.mrb[32].mxu1 %vm712_vm3, %v1845_v16  ;;  %2619 = vmatprep.subr.bf16.mxu0 %v2965_v6 }
0x1188   : > { %2626 = vmatpush3.bf16.msra.mxu1 %v2781_v41  ;;  %2629 = vmatprep.mubr.msk.bf16.mxu1 %vm2966_vm1, %v2965_v6  ;;  %vm1937_vm1 = vcmp.lt.s32.totalorder %v1936_v36, %v3281_v29 }
0x1189   : > { %2627 = vmatprep.subr.bf16.mxu1 %v2965_v6  ;;  %v1938_v47 = vsel %vm1937_vm1, 1, %v2967_v11 }
0x118a   : > { %2620 = vmatpush3.bf16.msra.mxu0 %v2782_v58 }
0x118c   : > { %2628 = vmatpush3.bf16.msra.mxu1 %v2783_v59 }
0x1258   : > { %v1829_v60 = vpop.f32.mrb[32].mxu0 }
0x1259   : > { %v1836_v61 = vrot.slane %v1829_v60, 1  ;;  %v2607_v17 = vpop.f32.mrb[33].mxu0  ;;  %v1839_v12 = vadd.f32 %v1829_v60, %v1787_v10 }
0x125a   : > { %v1832_v63 = vpop.f32.mrb[34].mxu0  ;;  %v1883_v1 = vpop.f32.mrb[32].mxu1 }
0x125b   : > { %v1840_v2 = vadd.f32 %v1836_v61, %v1788_v62  ;;  %v1890_v3 = vrot.slane %v1883_v1, 1  ;;  %v1893_v6 = vadd.f32 %v1883_v1, %v1841_v0  ;;  %v2608_v19 = vpop.f32.mrb[35].mxu0  ;;  %v2615_v4 = vpop.f32.mrb[33].mxu1  ;;  %v1965_v0 = vld [vmem:[#allocation4 + $0xf] sm:$0x1] }
0x125c   : > { %v1886_v5 = vpop.f32.mrb[34].mxu1  ;;  %v2018_v1 = vld [vmem:[#allocation5] sm:$0x1] }
0x125d   : > { %v1897_v7 = vrot.slane %v1840_v2, 7  ;;  %v1894_v8 = vadd.f32 %v1890_v3, %v1842_v21  ;;  %v2616_v9 = vpop.f32.mrb[35].mxu1  ;;  %v1902_v14 = vrot.slane %v1893_v6, 6  ;;  %v2019_v5 = vld [vmem:[#allocation5 + $0x8] sm:$0x1] }
0x125f   : > { %v1903_v20 = vrot.slane %v1894_v8, 5  ;;  %v1898_v22 = vsel %vm830_vm4, %v1897_v7, %v1839_v12  ;;  %v1964_v12 = vld [vmem:[#allocation4 + $0x7] sm:$0x1] }
0x1261   : > { %v1904_v23 = vsel %vm837_vm5, %v1903_v20, %v1902_v14 }
0x1262   : > { %v1906_v24 = vsel %vm680_vm6, %v1898_v22, %v1904_v23 }
0x1263   : > { %v2406_v26 = vmul.f32 -1.442695, %v1906_v24 }
0x1265   : > { %2768 = vpow2.f32 %v2406_v26 }
0x126f   : > { %v2769_v27 = vpop.eup %2768 }
0x1270   : > { %v1910_v28 = vadd.f32 1.0, %v2769_v27 }
0x1272   : > { %2770 = vrcp.f32 %v1910_v28 }
0x127c   : > { %v2771_v32 = vpop.eup %2770 }
0x127d   : > { %v1913_v46 = vmul.f32 %v2771_v32, %v3255_v13  ;;  %v2111_v32 = vstv %s3267_s21  ;;  %s3894_s21 = smov 96  }
0x127f   : > { %v1914_v42 = vadd.f32 %v1913_v46, %v3258_v15  ;;  %v2112_v46 = vsel %vm684_vm10, %v2110_v31, %v2111_v32 }
0x1281   : > { %1917 = vrot.lane.b32.xlu1 %v1914_v42, %s2969_s25  ;;  %v1915_v40 = vmul.f32 %v1914_v42, %v3626_v55 }
0x1285   : > { %1940 = vperm.xlu1 %2724, %v1938_v47  }
0x12f3   : > { %v1918_v39 = vpop.permute.xlu1 %1917 }
0x12f4   : > { %v1920_v53 = vmul.f32 %v1918_v39, %v1914_v42 }
0x12f6   : > { %1922 = vrot.lane.b32.xlu0 %v1920_v53, %s2970_s27  ;;  %v1063_v53 = vsel %vm1060_vm15, %v3359_v49, 0.0 }
0x12f7   : > { %v1071_v25 = vrot.slane %v1063_v53, %v3300_v43 }
0x1304   : > { %v3633_v57 = vpop.permute.xlu1 %1940 }
0x1305   : > { %vm1942_vm0 = vcmp.eq.s32.totalorder %v3633_v57, 1 }
0x1368   : > { %v1923_v34 = vpop.permute.xlu0 %1922 }
0x1369   : > { %v3629_v35 = vadd.f32 %v1923_v34, %v1915_v40 }
0x136b   : > { %2772 = vtanh.f32 %v3629_v35 }
0x1375   : > { %v2773_v16 = vpop.eup %2772 }
0x1376   : > { %1928 = vrot.lane.b32.xlu0 %v2773_v16, %s2969_s25 }
0x13e8   : > { %v1929_v41 = vpop.permute.xlu0 %1928 }
0x13e9   : > { %v1931_v58 = vmul.f32 %v1929_v41, %v1914_v42  ;;  %v1944_v41 = vsel %vm1942_vm0, %v3629_v35, %v3626_v55 }
0x13eb   : > { %v3639_v51 = vsel %vm1942_vm0, %v1931_v58, %v3583_v38  ;;  %v1945_v45 = vsel %vm1942_vm0, %v1931_v58, 0.0 }
0x13ec   : > { %v1963_v33 = vpack.c.bf16 %v3639_v51, %v3639_v51  ;;  %v1953_v54 = vrot.slane %v1945_v45, %v3300_v43 }
0x13ee   : > { %1967 = vrot.lane.b32.xlu1 %v1963_v33, %s2970_s27  ;;  %v2020_v59 = vrot.slane %v1963_v33, 1  ;;  %v1958_v35 = vcombine.high %v1953_v54, %v1953_v54 }
0x13f0   : > { %2021 = vrot.lane.b32.xlu0 %v2020_v59, %s2970_s27 }
0x1460   : > { %v1968_v60 = vpop.permute.xlu1 %1967 }
0x1461   : > { %2622 = vmatmul.mubr.msk.bf16.vlgmr.msra.gmra.mrb[36].mxu0 %vm712_vm3, %v1968_v60 }
0x1462   : > { %v2022_v61 = vpop.permute.xlu0 %2021 }
0x1463   : > { %2630 = vmatmul.mubr.msk.bf16.vlgmr.msra.gmra.mrb[36].mxu1 %vm712_vm3, %v2022_v61  ;;  %vm2113_vm3 = vcmp.lt.s32.totalorder %v2112_v46, %v3281_v29 }
0x1464   : > { %v2114_v39 = vsel %vm2113_vm3, 1, %v2967_v11  ;;  %v1242_v11 = vsel %vm1239_vm2, %v3412_v37, 0.0 }
0x1465   : > { %v1250_v29 = vrot.slane %v1242_v11, %v3300_v43 }
0x1467   : > { %v1255_v55 = vcombine.high %v1250_v29, %v1250_v29 }
0x1534   : > { %v2006_v17 = vpop.f32.mrb[36].mxu0 }
0x1535   : > { %v2013_v62 = vrot.slane %v2006_v17, 1  ;;  %v2623_v63 = vpop.f32.mrb[37].mxu0  ;;  %v2016_v14 = vadd.f32 %v2006_v17, %v1964_v12  ;;  %v1077_v17 = vcombine.high %v1071_v25, %v1071_v25 }
0x1536   : > { %v2009_v38 = vpop.f32.mrb[38].mxu0  ;;  %v2060_v2 = vpop.f32.mrb[36].mxu1 }
0x1537   : > { %v2017_v3 = vadd.f32 %v2013_v62, %v1965_v0  ;;  %v2067_v6 = vrot.slane %v2060_v2, 1  ;;  %v2070_v19 = vadd.f32 %v2060_v2, %v2018_v1  ;;  %v2624_v4 = vpop.f32.mrb[39].mxu0  ;;  %v2631_v21 = vpop.f32.mrb[37].mxu1 }
0x1538   : > { %v2063_v7 = vpop.f32.mrb[38].mxu1 }
0x1539   : > { %v2074_v8 = vrot.slane %v2017_v3, 7  ;;  %v2071_v9 = vadd.f32 %v2067_v6, %v2019_v5  ;;  %v2632_v10 = vpop.f32.mrb[39].mxu1  ;;  %v2079_v20 = vrot.slane %v2070_v19, 6 }
0x153b   : > { %v2080_v22 = vrot.slane %v2071_v9, 5  ;;  %v2075_v23 = vsel %vm830_vm4, %v2074_v8, %v2016_v14  ;;  %vm898_vm4 = vcmask 254976  }
0x153d   : > { %v2081_v24 = vsel %vm837_vm5, %v2080_v22, %v2079_v20  ;;  %vm1075_vm5 = vcmask 517376  }
0x153e   : > { %v2083_v26 = vsel %vm680_vm6, %v2075_v23, %v2081_v24  ;;  %vm1081_vm6 = vcmask 779776  }
0x153f   : > { %v2409_v27 = vmul.f32 -1.442695, %v2083_v26 }
0x1541   : > { %2774 = vpow2.f32 %v2409_v27 }
0x154b   : > { %v2775_v28 = vpop.eup %2774 }
0x154c   : > { %v2087_v30 = vadd.f32 1.0, %v2775_v28 }
0x154e   : > { %2776 = vrcp.f32 %v2087_v30 }
0x1558   : > { %v2777_v36 = vpop.eup %2776 }
0x1559   : > { %v2090_v42 = vmul.f32 %v2777_v36, %v3255_v13  ;;  %v1768_v13 = vsel %vm1765_vm14, %v3576_v56, 0.0 }
0x155b   : > { %v2091_v47 = vadd.f32 %v2090_v42, %v3258_v15  ;;  %v1776_v15 = vrot.slane %v1768_v13, %v3300_v43 }
0x155d   : > { %2094 = vrot.lane.b32.xlu1 %v2091_v47, %s2969_s25  ;;  %v2092_v58 = vmul.f32 %v2091_v47, %v1944_v41  ;;  %v1781_v62 = vcombine.high %v1776_v15, %v1776_v15 }
0x1561   : > { %2116 = vperm.xlu1 %2724, %v2114_v39  }
0x1565   : > { %895 = vrot.lane.b32.xlu1 %v3310_v48, %s2970_s27  ;;  %v1419_v48 = vsel %vm1416_vm8, %v3465_v50, 0.0 }
0x1566   : > { %v1428_v49 = vrot.slane %v1419_v48, %v3300_v43 }
0x1568   : > { %v1429_v44 = vcombine.high %v1428_v49, %v1428_v49 }
0x1569   : > { %1072 = vrot.lane.b32.xlu1 %v1071_v25, %s2969_s25 }
0x156d   : > { %1777 = vrot.lane.b32.xlu1 %v1776_v15, %s2969_s25 }
0x1571   : > { %1251 = vrot.lane.b32.xlu1 %v1250_v29, %s3894_s21 }
0x1575   : > { %1954 = vrot.lane.b32.xlu1 %v1953_v54, %s3894_s21 }
0x1579   : > { %1430 = vrot.lane.b32.xlu1 %v1429_v44, %s2970_s27 }
0x15cf   : > { %v2095_v37 = vpop.permute.xlu1 %2094 }
0x15d0   : > { %v2097_v56 = vmul.f32 %v2095_v37, %v2091_v47 }
0x15d2   : > { %2099 = vrot.lane.b32.xlu0 %v2097_v56, %s2970_s27 }
0x15e0   : > { %v2117_v18 = vpop.permute.xlu1 %2116 }
0x15e1   : > { %vm2118_vm10 = vcmp.eq.s32.totalorder %v2117_v18, 1 }
0x15e4   : > { %v896_v50 = vpop.permute.xlu1 %895 }
0x15e5   : > { %899 = vst.msk [vmem:[#allocation6] sm:$0x3] %vm898_vm4, %v896_v50 }
0x15e8   : > { %v1073_v40 = vpop.permute.xlu1 %1072 }
0x15e9   : > { %1076 = vst.msk [vmem:[#allocation6] sm:$0x3] %vm1075_vm5, %v1073_v40 }
0x15ec   : > { %v1778_v34 = vpop.permute.xlu1 %1777 }
0x15f0   : > { %v1252_v16 = vpop.permute.xlu1 %1251 }
0x15f1   : > { %1254 = vst.msk [vmem:[#allocation6] sm:$0x3] %vm1081_vm6, %v1252_v16 }
0x15f2   : > { %1420 = vst.msk [vmem:[#allocation6] sm:$0x3] %vm902_vm13, %v1419_v48 }
0x15f4   : > { %v1955_v2 = vpop.permute.xlu1 %1954 }
0x15f8   : > { %v1431_v4 = vpop.permute.xlu1 %1430 }
0x1644   : > { %v2100_v33 = vpop.permute.xlu0 %2099 }
0x1645   : > { %v2102_v59 = vadd.f32 %v2100_v33, %v2092_v58 }
0x1647   : > { %2778 = vtanh.f32 %v2102_v59  ;;  %v2120_v60 = vsel %vm2118_vm10, %v2102_v59, %v1944_v41 }
0x1651   : > { %v2779_v61 = vpop.eup %2778 }
0x1652   : > { %2105 = vrot.lane.b32.xlu0 %v2779_v61, %s2969_s25 }
0x1656   : > { %1602 = vrot.lane.b32.xlu0 %v3527_v52, %s2970_s27 }
0x165a   : > { %1078 = vrot.lane.b32.xlu0 %v1077_v17, %s3894_s21 }
0x165e   : > { %1782 = vrot.lane.b32.xlu0 %v1781_v62, %s3894_s21 }
0x1662   : > { %1256 = vrot.lane.b32.xlu0 %v1255_v55, %s2969_s25 }
0x1666   : > { %1959 = vrot.lane.b32.xlu0 %v1958_v35, %s2969_s25  ;;  %s3895_s25 = scalar_lea.vmem [#allocation12], %s3155_s20 }
0x16c4   : > { %v2106_v57 = vpop.permute.xlu0 %2105 }
0x16c5   : > { %v2108_v63 = vmul.f32 %v2106_v57, %v2091_v47 }
0x16c7   : > { %v2121_v0 = vsel %vm2118_vm10, %v2108_v63, 0.0  ;;  %v2119_v38 = vsel %vm2118_vm10, %v2108_v63, %v3639_v51 }
0x16c8   : > { %v2130_v52 = vrot.slane %v2121_v0, %v3300_v43  ;;  %2137 = vrot.lane.b32.xlu1 %v2119_v38, %s2970_s27  ;;  %v1603_v1 = vpop.permute.xlu0 %1602 }
0x16c9   : > { %1605 = vst.msk [vmem:[#allocation6 + $0x2] sm:$0x3] %vm898_vm4, %v1603_v1 }
0x16ca   : > { %1780 = vst.msk [vmem:[#allocation6 + $0x2] sm:$0x3] %vm1075_vm5, %v1778_v34  ;;  %v2131_v3 = vcombine.high %v2130_v52, %v2130_v52 }
0x16cb   : > { %1957 = vst.msk [vmem:[#allocation6 + $0x2] sm:$0x3] %vm1081_vm6, %v1955_v2 }
0x16cc   : > { %2122 = vst.msk [vmem:[#allocation6 + $0x2] sm:$0x3] %vm902_vm13, %v2121_v0  ;;  %2132 = vrot.lane.b32.xlu0 %v2131_v3, %s2970_s27  ;;  %v1079_v6 = vpop.permute.xlu0 %1078  ;;  %vm2140_vm13 = vcmask 257024  }
0x16cd   : > { %1082 = vst.msk [vmem:[#allocation7 + $0x2] sm:$0x3] %vm1081_vm6, %v1079_v6 }
0x16d0   : > { %2143 = vrot.lane.b32.xlu0 %v2120_v60, %s3894_s21  ;;  %v1783_v43 = vpop.permute.xlu0 %1782 }
0x16d1   : > { %1785 = vst.msk [vmem:[#allocation7] sm:$0x3] %vm1081_vm6, %v1783_v43 }
0x16d3   : > { %v2147_v51 = vld [vmem:[#allocation6] sm:$0xf] }
0x16d4   : > { %2148 = vst [vmem:[%s3160_s30] sm:$0xf] %v2147_v51  ;;  %v1257_v19 = vpop.permute.xlu0 %1256 }
0x16d5   : > { %1259 = vst.msk [vmem:[#allocation7 + $0x2] sm:$0x3] %vm1075_vm5, %v1257_v19 }
0x16d6   : > { %1433 = vst.msk [vmem:[#allocation7 + $0x2] sm:$0x3] %vm898_vm4, %v1431_v4 }
0x16d8   : > { %v1960_v21 = vpop.permute.xlu0 %1959 }
0x16d9   : > { %1962 = vst.msk [vmem:[#allocation7] sm:$0x3] %vm1075_vm5, %v1960_v21 }
0x173a   : > { %v2138_v5 = vpop.permute.xlu1 %2137 }
0x173b   : > { %2141 = vst.msk [vmem:[#allocation2] sm:$0xf] %vm2140_vm13, %v2138_v5  ;;  %2155 = vst.msk [vmem:[#allocation14] sm:$0xf] (!%p2410_p7), %vm2140_vm13, %v2138_v5 }
0x173e   : > { %v2133_v7 = vpop.permute.xlu0 %2132 }
0x173f   : > { %2135 = vst.msk [vmem:[#allocation7] sm:$0x3] %vm898_vm4, %v2133_v7 }
0x1741   : > { %2154 = sbr.rel (%p2410_p7) target bundleno = 5960 (0x1748), region = 128 }
0x1742   : > { %v2144_v8 = vpop.permute.xlu0 %2143 }
0x1743   : > { %2146 = vst.msk [vmem:[#allocation3] sm:$0xf] %vm2140_vm13, %v2144_v8  ;;  %2156 = vst.msk [vmem:[#allocation15] sm:$0xf] (!%p2410_p7), %vm2140_vm13, %v2144_v8 }
0x1746   : > { %v2149_v9 = vld [vmem:[#allocation7] sm:$0xf] }
0x1747   : > { %2150 = vst [vmem:[%s3895_s25] sm:$0xf] %v2149_v9 }
0x1748 PF: > { %s2162_s27 = sand.u32 1, %s3063_s16   ;;  %s3896_s18 = ssub.s32 2, %s3063_s16 }
0x1749   : > { %s2424_s23 = sshll.u32 %s3896_s18, 6  ;;  %s3897_s26 = scalar_lea.vmem [#allocation12], %s3155_s20 }
0x174a   : > { %s3729_s24 = scalar_lea.hbm %s3864_s7, %s2424_s23  ;;  %s2192_s22 = sshll.u32 %s3897_s26, 4  ;;  %s3733_s22 = int_to_ptr.vmem [resolvable:$true] %s2192_s22 }
0x174b   : > { %s2423_s21 = sshll.u32 %s3063_s16, 6  ;;  %s2163_s25 = scalar_lea.sflag [#allocation13], %s2162_s27 }
0x174c   : > { %s2784_s0 = scalar_lea.vmem %s3733_s22, 64  ;;  %s2973_s18 = smov [#allocation12]  }
0x174d   : > { %p2785_p9 = scmp.ne.s32.totalorder %s3733_s22, %s2784_s0  ;;  %s2788_s1 = sshll.u32 %s2973_s18, 4  ;;  %s2789_s1 = int_to_ptr.vmem [resolvable:$false] %s2788_s1 }
0x174e   : > { %s2790_s14 = scalar_lea.vmem %s2789_s1, 128  ;;  %p2791_p0 = scmp.lt.s32.totalorder %s3733_s22, %s2789_s1 }
0x174f   : > { %p2786_p10 = pnand %p2785_p9, %p3115_p11  ;;  %p2792_p2 = scmp.lt.s32.totalorder %s2790_s14, %s2784_s0 }
0x1751   : > { %p2787_p12 = pneg %p2786_p10  ;;  %p2793_p3 = por %p2792_p2, %p2791_p0 }
0x1753   : > { %p2794_p4 = pnand %p2793_p3, %p2787_p12 }
0x1755   : > { %2797 = shalt.err (!%p2794_p4)
}
0x1756   : > { %s2798_s20 = scalar_lea.hbm %s3729_s24, 64  ;;  %s2802_s28 = scalar_lea.hbm %s3864_s7, 192 }
0x1757   : > { %p2799_p5 = scmp.ne.s32.totalorder %s3729_s24, %s2798_s20  ;;  %p2803_p10 = scmp.lt.u32.totalorder %s3729_s24, %s3864_s7 }
0x1758   : > { %p2804_p12 = scmp.lt.u32.totalorder %s2802_s28, %s2798_s20  ;;  %p2806_p2 = scmp.lt.u32.totalorder %s2798_s20, %s3729_s24 }
0x1759   : > { %p2800_p7 = pnand %p2799_p5, %p3115_p11 }
0x175a   : > { %p2805_p0 = por %p2804_p12, %p2803_p10 }
0x175b   : > { %p2801_p9 = pneg %p2800_p7 }
0x175c   : > { %p2807_p3 = por %p2806_p2, %p2805_p0 }
0x175e   : > { %p2808_p4 = pnand %p2807_p3, %p2801_p9 }
0x1760   : > { %2811 = shalt.err (!%p2808_p4)
}
0x1761   : > { %2634 = dma.vmem_to_hbm [thread:$0]  (%p3115_p11), %s3733_s22, 64, %s3729_s24, %s2163_s25  }
0x1762   : > { %s3762_s14 = scalar_lea.hbm %s3863_s6, %s2423_s21  ;;  %s2177_s27 = sshll.u32 %s3160_s30, 4  ;;  %s2178_s27 = int_to_ptr.vmem [resolvable:$true] %s2177_s27 }
0x1763   : > { %s2158_s20 = scalar_lea.sflag [#allocation11], %s3148_s17  ;;  %s2812_s23 = scalar_lea.vmem %s2178_s27, 64 }
0x1764   : > { %p2813_p5 = scmp.ne.s32.totalorder %s2178_s27, %s2812_s23  ;;  %s2974_s19 = smov [#allocation10]  }
0x1765   : > { %s2816_s28 = sshll.u32 %s2974_s19, 4  ;;  %s2817_s28 = int_to_ptr.vmem [resolvable:$false] %s2816_s28 }
0x1766   : > { %p2814_p7 = pnand %p2813_p5, %p3105_p8  ;;  %s2818_s26 = scalar_lea.vmem %s2817_s28, 128 }
0x1767   : > { %p2819_p10 = scmp.lt.s32.totalorder %s2178_s27, %s2817_s28  ;;  %p2820_p11 = scmp.lt.s32.totalorder %s2818_s26, %s2812_s23 }
0x1768   : > { %p2815_p9 = pneg %p2814_p7 }
0x1769   : > { %p2821_p12 = por %p2820_p11, %p2819_p10 }
0x176b   : > { %p2822_p0 = pnand %p2821_p12, %p2815_p9 }
0x176d   : > { %2825 = shalt.err (!%p2822_p0)
}
0x176e   : > { %s2826_s17 = scalar_lea.hbm %s3762_s14, 64  ;;  %s2830_s22 = scalar_lea.hbm %s3863_s6, 192 }
0x176f   : > { %p2827_p2 = scmp.ne.s32.totalorder %s3762_s14, %s2826_s17  ;;  %p2831_p5 = scmp.lt.u32.totalorder %s3762_s14, %s3863_s6 }
0x1770   : > { %p2832_p7 = scmp.lt.u32.totalorder %s2830_s22, %s2826_s17  ;;  %p2834_p10 = scmp.lt.u32.totalorder %s2826_s17, %s3762_s14 }
0x1771   : > { %p2828_p3 = pnand %p2827_p2, %p3105_p8 }
0x1772   : > { %p2833_p9 = por %p2832_p7, %p2831_p5 }
0x1773   : > { %p2829_p4 = pneg %p2828_p3 }
0x1774   : > { %p2835_p11 = por %p2834_p10, %p2833_p9 }
0x1776   : > { %p2836_p12 = pnand %p2835_p11, %p2829_p4 }
0x1778   : > { %2839 = shalt.err (!%p2836_p12)
}
0x1779   : > { %2633 = dma.vmem_to_hbm [thread:$0]  (%p3105_p8), %s2178_s27, 64, %s3762_s14, %s2158_s20  }
0x177a   : > { %s2975_s1 = smov [#allocation14]   ;;  %s2976_s18 = smov [#allocation15]  }
0x177b   : > { %s2203_s0 = sshll.u32 %s2975_s1, 4  ;;  %s2214_s23 = sshll.u32 %s2976_s18, 4  ;;  %s2204_s0 = int_to_ptr.vmem [resolvable:$true] %s2203_s0  ;;  %s2215_s23 = int_to_ptr.vmem [resolvable:$true] %s2214_s23 }
0x177c   : > { %s2840_s19 = scalar_lea.vmem %s2204_s0, 64  ;;  %p2847_p5 = scmp.lt.s32.totalorder %s2204_s0, %s2204_s0 }
0x177d   : > { %p2841_p0 = scmp.ne.s32.totalorder %s2204_s0, %s2840_s19  ;;  %p2848_p7 = scmp.lt.s32.totalorder %s2840_s19, %s2840_s19 }
0x177f   : > { %p2842_p2 = pnand %p2841_p0, %p183_p6  ;;  %p2849_p9 = por %p2848_p7, %p2847_p5 }
0x1781   : > { %p2843_p3 = pneg %p2842_p2 }
0x1783   : > { %p2850_p4 = pnand %p2849_p9, %p2843_p3 }
0x1785   : > { %2853 = shalt.err (!%p2850_p4)
}
0x1786   : > { %s2854_s14 = scalar_lea.hbm %s3865_s8, 64 }
0x1787   : > { %p2855_p8 = scmp.ne.s32.totalorder %s3865_s8, %s2854_s14  ;;  %p2860_p12 = scmp.lt.u32.totalorder %s2854_s14, %s3865_s8 }
0x1789   : > { %p2856_p10 = pnand %p2855_p8, %p183_p6 }
0x178b   : > { %p2857_p11 = pneg %p2856_p10 }
0x178d   : > { %p2862_p0 = pnand %p2860_p12, %p2857_p11 }
0x178f   : > { %2865 = shalt.err (!%p2862_p0)
}
0x1790   : > { %2636 = dma.vmem_to_hbm [thread:$0]  (%p183_p6), %s2204_s0, 64, %s3865_s8, [#allocation13]  }
0x1791   : > { %s2866_s22 = scalar_lea.vmem %s2215_s23, 64  ;;  %p2873_p7 = scmp.lt.s32.totalorder %s2215_s23, %s2215_s23 }
0x1792   : > { %p2867_p2 = scmp.ne.s32.totalorder %s2215_s23, %s2866_s22  ;;  %p2874_p9 = scmp.lt.s32.totalorder %s2866_s22, %s2866_s22 }
0x1794   : > { %p2868_p3 = pnand %p2867_p2, %p183_p6  ;;  %p2875_p4 = por %p2874_p9, %p2873_p7 }
0x1796   : > { %p2869_p5 = pneg %p2868_p3 }
0x1798   : > { %p2876_p8 = pnand %p2875_p4, %p2869_p5 }
0x179a   : > { %2879 = shalt.err (!%p2876_p8)
}
0x179b   : > { %s2880_s1 = scalar_lea.hbm %s3866_s9, 64 }
0x179c   : > { %p2881_p10 = scmp.ne.s32.totalorder %s3866_s9, %s2880_s1  ;;  %p2886_p0 = scmp.lt.u32.totalorder %s2880_s1, %s3866_s9 }
0x179e   : > { %p2882_p11 = pnand %p2881_p10, %p183_p6 }
0x17a0   : > { %p2883_p12 = pneg %p2882_p11 }
0x17a2   : > { %p2888_p2 = pnand %p2886_p0, %p2883_p12 }
0x17a4   : > { %2891 = shalt.err (!%p2888_p2)
}
0x17a5   : > { %2638 = dma.vmem_to_hbm [thread:$0]  (%p183_p6), %s2215_s23, 64, %s3866_s9, [#allocation16]  }
0x17a6   : > { %2921 = dma.done.wait (%p183_p6), [#allocation13], 64  }
0x17a7   : > { %2923 = vsyncadd (%p183_p6), [#allocation13], 4294967232 }
0x17a8   : > { %2925 = dma.done.wait (%p183_p6), [#allocation16], 64  }
0x17a9   : > { %2927 = vsyncadd (%p183_p6), [#allocation16], 4294967232 }
0x17aa PF: > { %p2656_p3 = scmp.ge.s32.totalorder %s2962_s15, 2  ;;  %s2234_s20 = sand.u32 1, %s2942_s10  }
0x17ab   : > { %s2235_s23 = scalar_lea.sflag [#allocation11], %s2234_s20 }
0x17ac   : > { %p2646_p5 = pnand %p2656_p3, %p3121_p13 }
0x17ae   : > { %2929 = dma.done.wait (!%p2646_p5), %s2235_s23, 64  }
0x17af   : > { %2931 = vsyncadd (!%p2646_p5), %s2235_s23, 4294967232  ;;  %s3899_s26 = sadd.s32 4294967294, %s2962_s15   ;;  %p2649_p7 = pnand %p2656_p3, %p3125_p1 }
0x17b0   : > { %s2243_s30 = sand.u32 1, %s3899_s26  }
0x17b1   : > { %s2244_s24 = scalar_lea.sflag [#allocation13], %s2243_s30 }
0x17b2   : > { %2933 = dma.done.wait (!%p2649_p7), %s2244_s24, 64  }
0x17b3   : > { %2935 = vsyncadd (!%p2649_p7), %s2244_s24, 4294967232  ;;  %s3901_s15 = sld [smem:[#allocation22_spill]]  ;;  %s3902_s16 = sld [smem:[#allocation24_spill]] }
0x17b4   : > { %s3903_s22 = sld [smem:[#allocation21_spill]]  ;;  %s3904_s14 = sld [smem:[#allocation23_spill]] }
0x17b5   : > { %s3905_s30 = smov %s2946_s11  ;;  %s3906_s10 = smov %s2954_s13 }
0x17b6   : > { %s3907_s11 = smov %s2950_s12 }
0x17b9   : > { %p24_p6 = scmp.ge.s32.totalorder %s3901_s15, 5   ;;  %s3908_s12 = smov %s3902_s16 }
0x17ba   : > { %s3909_s13 = smov %s3903_s22 }
0x17bb   :  { %26 = sbr.rel (!%p24_p6) target bundleno = 11 (0xb), region = 216 }
0x17c2   :  { %2249 = vsyncpa [#allocation11], 1 }
0x17c3   :  { %2251 = vsyncpa [#allocation11 + $0x1], 1 }
0x17c4   :  { %2252 = vsyncpa [#allocation13], 1 }
0x17c5   :  { %2254 = vsyncpa [#allocation13 + $0x1], 1 }
0x17c6   :  { %2255 = vsyncpa [#allocation16], 1 }

</bundles_post_ra>
